<compile_context>
chip_gen: v6e
topology: v6e:2x2x1
jax: 0.10.0
libtpu: 0.0.40
codegen_flags: <defaults>
</compile_context>

<pallas_src>
import functools

import jax
import jax.numpy as jnp
from jax import lax
from jax.experimental import pallas as pl
from jax.experimental.pallas import tpu as pltpu


def _make_lstm_kernel(num_layers: int, seq_len: int, hidden: int):
    """Builds the stacked-LSTM + Linear kernel (one batch tile per grid step).

    Kernel ref order:
      x_ref                                : [T, Bt, D_in]  f32 (time-major batch tile)
      for each layer l: w_ih_T, w_hh_T, b  : [D_l, 4H] bf16, [H, 4H] bf16, [1, 4H] f32
                                             gate columns ordered (i, f, o, g); the g
                                             columns are pre-scaled by 2 (tanh-via-sigmoid)
      w_lin_T, b_lin                       : [H, O_pad] bf16, [1, O_pad] f32
      out_ref                              : [Bt, O_pad]
      gx_scratch (VMEM)                    : [T, Bt, 4H] f32  (precomputed input gates)
      seq_scratch (VMEM)                   : [T, Bt, H]  f32  (layer output sequence)
    """
    T = seq_len
    H = hidden
    # Full unroll only for short recurrences; bounded unroll keeps LLO visibility
    # without blowing up instruction footprint / vreg live ranges for long T.
    unroll = True if T <= 16 else 8

    def kernel(x_ref, *refs):
        seq_scratch = refs[-1]
        gx_scratch = refs[-2]
        out_ref = refs[-3]
        param_refs = refs[:-3]

        Bt = x_ref.shape[1]

        def gate_math(gates, c_prev):
            # gates: lane-dense [Bt, 4H] pre-activations, columns (i | f | o | 2*g).
            sg = jax.nn.sigmoid(gates)               # one EUP pass over the full tile
            i_g = sg[:, :H]
            f_g = sg[:, H:2 * H]
            o_g = sg[:, 2 * H:3 * H]
            g_g = 2.0 * sg[:, 3 * H:] - 1.0          # tanh(x) = 2*sigmoid(2x) - 1
            c = f_g * c_prev + i_g * g_g
            h = o_g * jnp.tanh(c)
            return h, c

        h_last = None
        for layer in range(num_layers):
            w_ih_t = param_refs[3 * layer][...]      # [D_l, 4H] bf16
            w_hh_t = param_refs[3 * layer + 1][...]  # [H, 4H]   bf16
            bias = param_refs[3 * layer + 2][...]    # [1, 4H]   f32  (b_ih + b_hh)

            # ---- Hoisted input projection: one batched bf16 matmul per layer,
            #      bias folded in, stored time-major in VMEM scratch.
            if layer == 0:
                inp2d = x_ref[...].reshape(T * Bt, -1)
            else:
                inp2d = seq_scratch[...].reshape(T * Bt, H)
            gx = jnp.dot(inp2d.astype(jnp.bfloat16), w_ih_t,
                         preferred_element_type=jnp.float32) + bias
            gx_scratch[...] = gx.reshape(T, Bt, 4 * H)

            write_seq = layer != num_layers - 1  # top layer only needs the last h

            # ---- Peeled t = 0: h0 = c0 = 0, so no h @ w_hh_T and no f*c term.
            sg0 = jax.nn.sigmoid(gx_scratch[0])
            c = sg0[:, :H] * (2.0 * sg0[:, 3 * H:] - 1.0)   # i * tanh(g)
            h = sg0[:, 2 * H:3 * H] * jnp.tanh(c)           # o * tanh(c)
            if write_seq:
                seq_scratch[0] = h

            # TODO(synk): hold w_hh_T resident in the MXU weight registers across the
            # T loop (pltpu.matmul_push_rhs / matmul_acc_lhs / matmul_pop) instead of
            # re-loading the RHS every step via jnp.dot.
            def step(t, carry, w_hh_t=w_hh_t, write_seq=write_seq):
                h, c = carry
                gates = gx_scratch[t] + jnp.dot(
                    h.astype(jnp.bfloat16), w_hh_t,
                    preferred_element_type=jnp.float32)
                h, c = gate_math(gates, c)
                if write_seq:
                    seq_scratch[t] = h
                return h, c

            h_last, _ = lax.fori_loop(1, T, step, (h, c), unroll=unroll)

        # Final Linear on the last timestep of the top layer (lane-dense padded output).
        w_lin_t = param_refs[3 * num_layers][...]      # [H, O_pad] bf16
        b_lin = param_refs[3 * num_layers + 1][...]    # [1, O_pad] f32
        out_ref[...] = (
            jnp.dot(h_last.astype(jnp.bfloat16), w_lin_t,
                    preferred_element_type=jnp.float32) + b_lin
        ).astype(out_ref.dtype)

    return kernel


def _reorder_and_scale_gates(w, hidden):
    """PyTorch packs LSTM gate rows as [i; f; g; o].

    Reorder to [i; f; o; g] and scale the g rows by 2 so that one sigmoid over the
    packed gates yields tanh for g via 2*sigmoid(2x) - 1.
    """
    i = w[:hidden]
    f = w[hidden:2 * hidden]
    g = w[2 * hidden:3 * hidden]
    o = w[3 * hidden:4 * hidden]
    return jnp.concatenate([i, f, o, 2.0 * g], axis=0)


def _choose_batch_tiling(batch):
    """Pick (batch_tile, padded_batch).

    batch_tile is a multiple of 8 and <= 128.  When the batch is big enough, produce
    >= 2 grid tiles so v7x's "parallel" axis can shard across both TensorCores; tiny
    batches keep a single 8-row tile (splitting pure padding would only add work).
    """
    bp8 = ((batch + 7) // 8) * 8
    if bp8 <= 8:
        return 8, 8
    tile = min(128, ((bp8 + 15) // 16) * 8)   # ~half the padded batch, multiple of 8
    bp = ((bp8 + tile - 1) // tile) * tile
    return tile, bp


def _vmem_limit_bytes(T, bt, d_in, hidden, o_pad, num_layers):
    """Explicit scoped-VMEM budget with generous headroom (v7x has only 64 MiB)."""
    f32, bf16 = 4, 2
    scratch = T * bt * 4 * hidden * f32 + T * bt * hidden * f32
    blocks = 2 * T * bt * d_in * f32 + 2 * bt * o_pad * f32   # double-buffered in/out
    weights = 0
    d = d_in
    for _ in range(num_layers):
        weights += (d + hidden) * 4 * hidden * bf16 + 4 * hidden * f32
        d = hidden
    weights += hidden * o_pad * bf16 + o_pad * f32
    need = scratch + blocks + 2 * weights
    return int(min(max(4 * need, 16 * 1024 * 1024), 48 * 1024 * 1024))


def init_lstm_params(key, input_size, num_layers, hidden_size, output_size):
    """Deterministic parameter init mimicking nn.LSTM / nn.Linear shapes (torch layout)."""
    params = {"lstm": [], "linear": {}}
    k = 1.0 / jnp.sqrt(hidden_size)
    for layer in range(num_layers):
        d_in = input_size if layer == 0 else hidden_size
        key, k1, k2, k3, k4 = jax.random.split(key, 5)
        w_ih = jax.random.uniform(k1, (4 * hidden_size, d_in), jnp.float32, -k, k)
        w_hh = jax.random.uniform(k2, (4 * hidden_size, hidden_size), jnp.float32, -k, k)
        b_ih = jax.random.uniform(k3, (4 * hidden_size,), jnp.float32, -k, k)
        b_hh = jax.random.uniform(k4, (4 * hidden_size,), jnp.float32, -k, k)
        params["lstm"].append({"w_ih": w_ih, "w_hh": w_hh, "b_ih": b_ih, "b_hh": b_hh})
    kl = 1.0 / jnp.sqrt(hidden_size)
    key, k1, k2 = jax.random.split(key, 3)
    params["linear"]["w"] = jax.random.uniform(
        k1, (output_size, hidden_size), jnp.float32, -kl, kl)
    params["linear"]["b"] = jax.random.uniform(k2, (output_size,), jnp.float32, -kl, kl)
    return params


@functools.partial(jax.jit, static_argnames=("num_layers", "hidden_size", "output_size"))
def lstm_forward(x, params, *, num_layers, hidden_size, output_size):
    """Forward pass equivalent to the PyTorch LSTM module.

    x: [batch, ch_out, seq_len, width] (float32). Returns [batch, output_size].
    """
    B, C, T, W = x.shape
    d_in = C * W
    H = hidden_size

    # torch: permute((0, 2, 1, 3)).reshape((B, T, -1)); the kernel wants time-major.
    # Collapsed into a single layout op: [B, C, T, W] -> [T, B, C*W].
    x_tm = jnp.transpose(x, (2, 0, 1, 3)).reshape(T, B, d_in).astype(jnp.float32)

    B_TILE, Bp = _choose_batch_tiling(B)
    if Bp != B:
        x_tm = jnp.pad(x_tm, ((0, 0), (0, Bp - B), (0, 0)))

    # Pad the Linear output to 128 lanes so the final store is lane-dense.
    O_pad = ((output_size + 127) // 128) * 128

    flat_inputs = [x_tm]
    in_specs = [pl.BlockSpec((T, B_TILE, d_in), lambda b: (0, b, 0))]
    for layer in range(num_layers):
        p = params["lstm"][layer]
        w_ih_t = _reorder_and_scale_gates(
            jnp.asarray(p["w_ih"]), H).T.astype(jnp.bfloat16)      # [D_l, 4H] bf16
        w_hh_t = _reorder_and_scale_gates(
            jnp.asarray(p["w_hh"]), H).T.astype(jnp.bfloat16)      # [H, 4H]   bf16
        bias = _reorder_and_scale_gates(
            p["b_ih"] + p["b_hh"], H).reshape(1, 4 * H).astype(jnp.float32)
        for arr in (w_ih_t, w_hh_t, bias):
            flat_inputs.append(arr)
            in_specs.append(pl.BlockSpec(arr.shape, lambda b: (0, 0)))
    w_lin_t = jnp.pad(jnp.asarray(params["linear"]["w"]).T,
                      ((0, 0), (0, O_pad - output_size))).astype(jnp.bfloat16)
    b_lin = jnp.pad(jnp.asarray(params["linear"]["b"]),
                    (0, O_pad - output_size)).reshape(1, O_pad).astype(jnp.float32)
    for arr in (w_lin_t, b_lin):
        flat_inputs.append(arr)
        in_specs.append(pl.BlockSpec(arr.shape, lambda b: (0, 0)))

    kernel = _make_lstm_kernel(num_layers, T, H)

    out = pl.pallas_call(
        kernel,
        out_shape=jax.ShapeDtypeStruct((Bp, O_pad), jnp.float32),
        grid_spec=pltpu.PrefetchScalarGridSpec(
            num_scalar_prefetch=0,
            grid=(Bp // B_TILE,),
            in_specs=in_specs,
            out_specs=pl.BlockSpec((B_TILE, O_pad), lambda b: (b, 0)),
            scratch_shapes=[
                pltpu.VMEM((T, B_TILE, 4 * H), jnp.float32),  # precomputed input-side gates
                # TODO(synk): store gx/seq in bf16 (or chunk the projection over T) once
                # T * B_TILE grows enough to threaten v7x's 64 MiB VMEM.
                pltpu.VMEM((T, B_TILE, H), jnp.float32),      # layer output sequence
            ],
        ),
        compiler_params=pltpu.CompilerParams(
            dimension_semantics=("parallel",),
            vmem_limit_bytes=_vmem_limit_bytes(T, B_TILE, d_in, H, O_pad, num_layers),
        ),
    )(*flat_inputs)

    return out[:B, :output_size]


def _reference_forward(x, params, num_layers, hidden_size, output_size):
    """Pure-JAX f32 reference in the original PyTorch gate order (i, f, g, o)."""
    B, C, T, W = x.shape
    seq = jnp.transpose(x, (0, 2, 1, 3)).reshape(B, T, C * W).astype(jnp.float32)
    inp = seq
    for layer in range(num_layers):
        p = params["lstm"][layer]
        h = jnp.zeros((B, hidden_size), jnp.float32)
        c = jnp.zeros((B, hidden_size), jnp.float32)
        outs = []
        for t in range(T):
            gates = inp[:, t, :] @ p["w_ih"].T + p["b_ih"] + h @ p["w_hh"].T + p["b_hh"]
            i = jax.nn.sigmoid(gates[:, 0:hidden_size])
            f = jax.nn.sigmoid(gates[:, hidden_size:2 * hidden_size])
            g = jnp.tanh(gates[:, 2 * hidden_size:3 * hidden_size])
            o = jax.nn.sigmoid(gates[:, 3 * hidden_size:4 * hidden_size])
            c = f * c + i * g
            h = o * jnp.tanh(c)
            outs.append(h)
        inp = jnp.stack(outs, axis=1)
    return inp[:, -1, :] @ params["linear"]["w"].T + params["linear"]["b"]


if __name__ == "__main__":
    # Small shapes consistent with the module's forward contract.
    batch_size = 2
    ch_out = 4
    seq_len = 8
    width = 16
    input_size = ch_out * width          # 64
    num_lstm_layer = 2
    hidden_size = 32
    output_size = 16

    key = jax.random.PRNGKey(0)
    key, xk, pk = jax.random.split(key, 3)
    x = jax.random.normal(xk, (batch_size, ch_out, seq_len, width), jnp.float32)
    params = init_lstm_params(pk, input_size, num_lstm_layer, hidden_size, output_size)

    # TODO(synk): torch's flatten_parameters() is cuDNN-specific and has no TPU equivalent (no-op).
    out = lstm_forward(
        x, params,
        num_layers=num_lstm_layer,
        hidden_size=hidden_size,
        output_size=output_size,
    )
    out = jax.block_until_ready(out)

    ref = _reference_forward(x, params, num_lstm_layer, hidden_size, output_size)
    assert out.shape == (batch_size, output_size)
    # Looser tolerance than before: matmul operands are bf16 on the MXU (accumulation
    # and all gate/cell elementwise math stay f32).
    assert jnp.allclose(out, ref, atol=2e-2, rtol=2e-2), "mismatch vs reference"

    print("KERNEL_OK")
</pallas_src>

<mosaic_0001>
module attributes {stable_mosaic.version = 11 : i64} {
  func.func @kernel(%arg0: i32, %arg1: memref<8x8x64xf32, #tpu.memory_space<vmem>>, %arg2: memref<64x128xbf16, #tpu.memory_space<vmem>>, %arg3: memref<32x128xbf16, #tpu.memory_space<vmem>>, %arg4: memref<1x128xf32, #tpu.memory_space<vmem>>, %arg5: memref<32x128xbf16, #tpu.memory_space<vmem>>, %arg6: memref<32x128xbf16, #tpu.memory_space<vmem>>, %arg7: memref<1x128xf32, #tpu.memory_space<vmem>>, %arg8: memref<32x128xbf16, #tpu.memory_space<vmem>>, %arg9: memref<1x128xf32, #tpu.memory_space<vmem>>, %arg10: memref<8x128xf32, #tpu.memory_space<vmem>>, %arg11: memref<8x8x128xf32, #tpu.memory_space<vmem>>, %arg12: memref<8x8x32xf32, #tpu.memory_space<vmem>>) attributes {dimension_semantics = [#tpu.dimension_semantics<parallel>], iteration_bounds = array<i64: 1>, scalar_prefetch = 0 : i64, scratch_operands = 2 : i64, tpu.core_type = #tpu.core_type<tc>, window_params = [{transform_indices = @transform_0, window_bounds = array<i64: 8, 8, 64>}, {pipeline_mode = #tpu.pipeline_mode<synchronous>, transform_indices = @transform_1, window_bounds = array<i64: 64, 128>}, {pipeline_mode = #tpu.pipeline_mode<synchronous>, transform_indices = @transform_2, window_bounds = array<i64: 32, 128>}, {pipeline_mode = #tpu.pipeline_mode<synchronous>, transform_indices = @transform_3, window_bounds = array<i64: 1, 128>}, {pipeline_mode = #tpu.pipeline_mode<synchronous>, transform_indices = @transform_4, window_bounds = array<i64: 32, 128>}, {pipeline_mode = #tpu.pipeline_mode<synchronous>, transform_indices = @transform_5, window_bounds = array<i64: 32, 128>}, {pipeline_mode = #tpu.pipeline_mode<synchronous>, transform_indices = @transform_6, window_bounds = array<i64: 1, 128>}, {pipeline_mode = #tpu.pipeline_mode<synchronous>, transform_indices = @transform_7, window_bounds = array<i64: 32, 128>}, {pipeline_mode = #tpu.pipeline_mode<synchronous>, transform_indices = @transform_8, window_bounds = array<i64: 1, 128>}, {transform_indices = @transform_9, window_bounds = array<i64: 8, 128>}]} {
    %c0 = arith.constant 0 : index
    %c0_0 = arith.constant 0 : index
    %0 = vector.load %arg2[%c0, %c0_0] : memref<64x128xbf16, #tpu.memory_space<vmem>>, vector<64x128xbf16>
    %c0_1 = arith.constant 0 : index
    %c0_2 = arith.constant 0 : index
    %1 = vector.load %arg3[%c0_1, %c0_2] : memref<32x128xbf16, #tpu.memory_space<vmem>>, vector<32x128xbf16>
    %c0_3 = arith.constant 0 : index
    %c0_4 = arith.constant 0 : index
    %2 = vector.load %arg4[%c0_3, %c0_4] : memref<1x128xf32, #tpu.memory_space<vmem>>, vector<1x128xf32>
    %c0_5 = arith.constant 0 : index
    %c0_6 = arith.constant 0 : index
    %c0_7 = arith.constant 0 : index
    %3 = vector.load %arg1[%c0_5, %c0_6, %c0_7] : memref<8x8x64xf32, #tpu.memory_space<vmem>>, vector<8x8x64xf32>
    %4 = vector.shape_cast %3 : vector<8x8x64xf32> to vector<64x64xf32>
    %5 = arith.truncf %4 : vector<64x64xf32> to vector<64x64xbf16>
    %cst = arith.constant dense<0.000000e+00> : vector<64x128xf32>
    %6 = tpu.matmul %5, %0, %cst {dimension_numbers = #tpu.dot_dimension_numbers<[1], [0], [0], [1], [0, 0, 1, 1], [], []>} : vector<64x64xbf16>, vector<64x128xbf16>, vector<64x128xf32> -> vector<64x128xf32>
    %7 = vector.broadcast %2 : vector<1x128xf32> to vector<64x128xf32>
    %8 = arith.addf %6, %7 : vector<64x128xf32>
    %9 = vector.shape_cast %8 : vector<64x128xf32> to vector<8x8x128xf32>
    %c0_8 = arith.constant 0 : index
    %c0_9 = arith.constant 0 : index
    %c0_10 = arith.constant 0 : index
    %10 = vector.load %arg11[%c0_8, %c0_9, %c0_10] : memref<8x8x128xf32, #tpu.memory_space<vmem>>, vector<8x8x128xf32>
    tpu.vector_store %arg11[%c0_8, %c0_9, %c0_10], %9 {strides = array<i32>} : memref<8x8x128xf32, #tpu.memory_space<vmem>>, vector<8x8x128xf32>,
    %c0_11 = arith.constant 0 : index
    %c0_12 = arith.constant 0 : index
    %c0_13 = arith.constant 0 : index
    %11 = vector.load %arg11[%c0_11, %c0_12, %c0_13] : memref<8x8x128xf32, #tpu.memory_space<vmem>>, vector<1x8x128xf32>
    %12 = vector.shape_cast %11 : vector<1x8x128xf32> to vector<8x128xf32>
    %13 = arith.negf %12 : vector<8x128xf32>
    %14 = math.exp %13 : vector<8x128xf32>
    %cst_14 = arith.constant 1.000000e+00 : f32
    %15 = vector.broadcast %cst_14 : f32 to vector<8x128xf32>
    %16 = arith.addf %15, %14 : vector<8x128xf32>
    %17 = arith.divf %15, %16 : vector<8x128xf32>
    %18 = vector.extract_strided_slice %17 {offsets = [0, 0], sizes = [8, 32], strides = [1, 1]} : vector<8x128xf32> to vector<8x32xf32>
    %19 = vector.extract_strided_slice %17 {offsets = [0, 96], sizes = [8, 32], strides = [1, 1]} : vector<8x128xf32> to vector<8x32xf32>
    %cst_15 = arith.constant 2.000000e+00 : f32
    %20 = vector.broadcast %cst_15 : f32 to vector<8x32xf32>
    %21 = arith.mulf %20, %19 : vector<8x32xf32>
    %cst_16 = arith.constant 1.000000e+00 : f32
    %22 = vector.broadcast %cst_16 : f32 to vector<8x32xf32>
    %23 = arith.subf %21, %22 : vector<8x32xf32>
    %24 = arith.mulf %18, %23 : vector<8x32xf32>
    %25 = vector.extract_strided_slice %17 {offsets = [0, 64], sizes = [8, 32], strides = [1, 1]} : vector<8x128xf32> to vector<8x32xf32>
    %26 = math.tanh %24 : vector<8x32xf32>
    %27 = arith.mulf %25, %26 : vector<8x32xf32>
    %c0_17 = arith.constant 0 : index
    %c0_18 = arith.constant 0 : index
    %c0_19 = arith.constant 0 : index
    %28 = vector.load %arg12[%c0_17, %c0_18, %c0_19] : memref<8x8x32xf32, #tpu.memory_space<vmem>>, vector<1x8x32xf32>
    %29 = vector.shape_cast %28 : vector<1x8x32xf32> to vector<8x32xf32>
    %30 = vector.shape_cast %27 : vector<8x32xf32> to vector<1x8x32xf32>
    tpu.vector_store %arg12[%c0_17, %c0_18, %c0_19], %30 {strides = array<i32>} : memref<8x8x32xf32, #tpu.memory_space<vmem>>, vector<1x8x32xf32>,
    %c1_i32 = arith.constant 1 : i32
    %31 = arith.index_cast %c1_i32 : i32 to index
    %c0_20 = arith.constant 0 : index
    %c0_21 = arith.constant 0 : index
    %32 = vector.load %arg11[%31, %c0_20, %c0_21] : memref<8x8x128xf32, #tpu.memory_space<vmem>>, vector<1x8x128xf32>
    %33 = vector.shape_cast %32 : vector<1x8x128xf32> to vector<8x128xf32>
    %34 = arith.truncf %27 : vector<8x32xf32> to vector<8x32xbf16>
    %cst_22 = arith.constant dense<0.000000e+00> : vector<8x128xf32>
    %35 = tpu.matmul %34, %1, %cst_22 {dimension_numbers = #tpu.dot_dimension_numbers<[1], [0], [0], [1], [0, 0, 1, 1], [], []>} : vector<8x32xbf16>, vector<32x128xbf16>, vector<8x128xf32> -> vector<8x128xf32>
    %36 = arith.addf %33, %35 : vector<8x128xf32>
    %37 = arith.negf %36 : vector<8x128xf32>
    %38 = math.exp %37 : vector<8x128xf32>
    %cst_23 = arith.constant 1.000000e+00 : f32
    %39 = vector.broadcast %cst_23 : f32 to vector<8x128xf32>
    %40 = arith.addf %39, %38 : vector<8x128xf32>
    %41 = arith.divf %39, %40 : vector<8x128xf32>
    %42 = vector.extract_strided_slice %41 {offsets = [0, 0], sizes = [8, 32], strides = [1, 1]} : vector<8x128xf32> to vector<8x32xf32>
    %43 = vector.extract_strided_slice %41 {offsets = [0, 32], sizes = [8, 32], strides = [1, 1]} : vector<8x128xf32> to vector<8x32xf32>
    %44 = vector.extract_strided_slice %41 {offsets = [0, 64], sizes = [8, 32], strides = [1, 1]} : vector<8x128xf32> to vector<8x32xf32>
    %45 = vector.extract_strided_slice %41 {offsets = [0, 96], sizes = [8, 32], strides = [1, 1]} : vector<8x128xf32> to vector<8x32xf32>
    %cst_24 = arith.constant 2.000000e+00 : f32
    %46 = vector.broadcast %cst_24 : f32 to vector<8x32xf32>
    %47 = arith.mulf %46, %45 : vector<8x32xf32>
    %cst_25 = arith.constant 1.000000e+00 : f32
    %48 = vector.broadcast %cst_25 : f32 to vector<8x32xf32>
    %49 = arith.subf %47, %48 : vector<8x32xf32>
    %50 = arith.mulf %43, %24 : vector<8x32xf32>
    %51 = arith.mulf %42, %49 : vector<8x32xf32>
    %52 = arith.addf %50, %51 : vector<8x32xf32>
    %53 = math.tanh %52 : vector<8x32xf32>
    %54 = arith.mulf %44, %53 : vector<8x32xf32>
    %55 = arith.index_cast %c1_i32 : i32 to index
    %c0_26 = arith.constant 0 : index
    %c0_27 = arith.constant 0 : index
    %56 = vector.load %arg12[%55, %c0_26, %c0_27] : memref<8x8x32xf32, #tpu.memory_space<vmem>>, vector<1x8x32xf32>
    %57 = vector.shape_cast %56 : vector<1x8x32xf32> to vector<8x32xf32>
    %58 = vector.shape_cast %54 : vector<8x32xf32> to vector<1x8x32xf32>
    tpu.vector_store %arg12[%55, %c0_26, %c0_27], %58 {strides = array<i32>} : memref<8x8x32xf32, #tpu.memory_space<vmem>>, vector<1x8x32xf32>,
    %c2_i32 = arith.constant 2 : i32
    %59 = arith.index_cast %c2_i32 : i32 to index
    %c0_28 = arith.constant 0 : index
    %c0_29 = arith.constant 0 : index
    %60 = vector.load %arg11[%59, %c0_28, %c0_29] : memref<8x8x128xf32, #tpu.memory_space<vmem>>, vector<1x8x128xf32>
    %61 = vector.shape_cast %60 : vector<1x8x128xf32> to vector<8x128xf32>
    %62 = arith.truncf %54 : vector<8x32xf32> to vector<8x32xbf16>
    %cst_30 = arith.constant dense<0.000000e+00> : vector<8x128xf32>
    %63 = tpu.matmul %62, %1, %cst_30 {dimension_numbers = #tpu.dot_dimension_numbers<[1], [0], [0], [1], [0, 0, 1, 1], [], []>} : vector<8x32xbf16>, vector<32x128xbf16>, vector<8x128xf32> -> vector<8x128xf32>
    %64 = arith.addf %61, %63 : vector<8x128xf32>
    %65 = arith.negf %64 : vector<8x128xf32>
    %66 = math.exp %65 : vector<8x128xf32>
    %cst_31 = arith.constant 1.000000e+00 : f32
    %67 = vector.broadcast %cst_31 : f32 to vector<8x128xf32>
    %68 = arith.addf %67, %66 : vector<8x128xf32>
    %69 = arith.divf %67, %68 : vector<8x128xf32>
    %70 = vector.extract_strided_slice %69 {offsets = [0, 0], sizes = [8, 32], strides = [1, 1]} : vector<8x128xf32> to vector<8x32xf32>
    %71 = vector.extract_strided_slice %69 {offsets = [0, 32], sizes = [8, 32], strides = [1, 1]} : vector<8x128xf32> to vector<8x32xf32>
    %72 = vector.extract_strided_slice %69 {offsets = [0, 64], sizes = [8, 32], strides = [1, 1]} : vector<8x128xf32> to vector<8x32xf32>
    %73 = vector.extract_strided_slice %69 {offsets = [0, 96], sizes = [8, 32], strides = [1, 1]} : vector<8x128xf32> to vector<8x32xf32>
    %cst_32 = arith.constant 2.000000e+00 : f32
    %74 = vector.broadcast %cst_32 : f32 to vector<8x32xf32>
    %75 = arith.mulf %74, %73 : vector<8x32xf32>
    %cst_33 = arith.constant 1.000000e+00 : f32
    %76 = vector.broadcast %cst_33 : f32 to vector<8x32xf32>
    %77 = arith.subf %75, %76 : vector<8x32xf32>
    %78 = arith.mulf %71, %52 : vector<8x32xf32>
    %79 = arith.mulf %70, %77 : vector<8x32xf32>
    %80 = arith.addf %78, %79 : vector<8x32xf32>
    %81 = math.tanh %80 : vector<8x32xf32>
    %82 = arith.mulf %72, %81 : vector<8x32xf32>
    %83 = arith.index_cast %c2_i32 : i32 to index
    %c0_34 = arith.constant 0 : index
    %c0_35 = arith.constant 0 : index
    %84 = vector.load %arg12[%83, %c0_34, %c0_35] : memref<8x8x32xf32, #tpu.memory_space<vmem>>, vector<1x8x32xf32>
    %85 = vector.shape_cast %84 : vector<1x8x32xf32> to vector<8x32xf32>
    %86 = vector.shape_cast %82 : vector<8x32xf32> to vector<1x8x32xf32>
    tpu.vector_store %arg12[%83, %c0_34, %c0_35], %86 {strides = array<i32>} : memref<8x8x32xf32, #tpu.memory_space<vmem>>, vector<1x8x32xf32>,
    %c3_i32 = arith.constant 3 : i32
    %87 = arith.index_cast %c3_i32 : i32 to index
    %c0_36 = arith.constant 0 : index
    %c0_37 = arith.constant 0 : index
    %88 = vector.load %arg11[%87, %c0_36, %c0_37] : memref<8x8x128xf32, #tpu.memory_space<vmem>>, vector<1x8x128xf32>
    %89 = vector.shape_cast %88 : vector<1x8x128xf32> to vector<8x128xf32>
    %90 = arith.truncf %82 : vector<8x32xf32> to vector<8x32xbf16>
    %cst_38 = arith.constant dense<0.000000e+00> : vector<8x128xf32>
    %91 = tpu.matmul %90, %1, %cst_38 {dimension_numbers = #tpu.dot_dimension_numbers<[1], [0], [0], [1], [0, 0, 1, 1], [], []>} : vector<8x32xbf16>, vector<32x128xbf16>, vector<8x128xf32> -> vector<8x128xf32>
    %92 = arith.addf %89, %91 : vector<8x128xf32>
    %93 = arith.negf %92 : vector<8x128xf32>
    %94 = math.exp %93 : vector<8x128xf32>
    %cst_39 = arith.constant 1.000000e+00 : f32
    %95 = vector.broadcast %cst_39 : f32 to vector<8x128xf32>
    %96 = arith.addf %95, %94 : vector<8x128xf32>
    %97 = arith.divf %95, %96 : vector<8x128xf32>
    %98 = vector.extract_strided_slice %97 {offsets = [0, 0], sizes = [8, 32], strides = [1, 1]} : vector<8x128xf32> to vector<8x32xf32>
    %99 = vector.extract_strided_slice %97 {offsets = [0, 32], sizes = [8, 32], strides = [1, 1]} : vector<8x128xf32> to vector<8x32xf32>
    %100 = vector.extract_strided_slice %97 {offsets = [0, 64], sizes = [8, 32], strides = [1, 1]} : vector<8x128xf32> to vector<8x32xf32>
    %101 = vector.extract_strided_slice %97 {offsets = [0, 96], sizes = [8, 32], strides = [1, 1]} : vector<8x128xf32> to vector<8x32xf32>
    %cst_40 = arith.constant 2.000000e+00 : f32
    %102 = vector.broadcast %cst_40 : f32 to vector<8x32xf32>
    %103 = arith.mulf %102, %101 : vector<8x32xf32>
    %cst_41 = arith.constant 1.000000e+00 : f32
    %104 = vector.broadcast %cst_41 : f32 to vector<8x32xf32>
    %105 = arith.subf %103, %104 : vector<8x32xf32>
    %106 = arith.mulf %99, %80 : vector<8x32xf32>
    %107 = arith.mulf %98, %105 : vector<8x32xf32>
    %108 = arith.addf %106, %107 : vector<8x32xf32>
    %109 = math.tanh %108 : vector<8x32xf32>
    %110 = arith.mulf %100, %109 : vector<8x32xf32>
    %111 = arith.index_cast %c3_i32 : i32 to index
    %c0_42 = arith.constant 0 : index
    %c0_43 = arith.constant 0 : index
    %112 = vector.load %arg12[%111, %c0_42, %c0_43] : memref<8x8x32xf32, #tpu.memory_space<vmem>>, vector<1x8x32xf32>
    %113 = vector.shape_cast %112 : vector<1x8x32xf32> to vector<8x32xf32>
    %114 = vector.shape_cast %110 : vector<8x32xf32> to vector<1x8x32xf32>
    tpu.vector_store %arg12[%111, %c0_42, %c0_43], %114 {strides = array<i32>} : memref<8x8x32xf32, #tpu.memory_space<vmem>>, vector<1x8x32xf32>,
    %c4_i32 = arith.constant 4 : i32
    %115 = arith.index_cast %c4_i32 : i32 to index
    %c0_44 = arith.constant 0 : index
    %c0_45 = arith.constant 0 : index
    %116 = vector.load %arg11[%115, %c0_44, %c0_45] : memref<8x8x128xf32, #tpu.memory_space<vmem>>, vector<1x8x128xf32>
    %117 = vector.shape_cast %116 : vector<1x8x128xf32> to vector<8x128xf32>
    %118 = arith.truncf %110 : vector<8x32xf32> to vector<8x32xbf16>
    %cst_46 = arith.constant dense<0.000000e+00> : vector<8x128xf32>
    %119 = tpu.matmul %118, %1, %cst_46 {dimension_numbers = #tpu.dot_dimension_numbers<[1], [0], [0], [1], [0, 0, 1, 1], [], []>} : vector<8x32xbf16>, vector<32x128xbf16>, vector<8x128xf32> -> vector<8x128xf32>
    %120 = arith.addf %117, %119 : vector<8x128xf32>
    %121 = arith.negf %120 : vector<8x128xf32>
    %122 = math.exp %121 : vector<8x128xf32>
    %cst_47 = arith.constant 1.000000e+00 : f32
    %123 = vector.broadcast %cst_47 : f32 to vector<8x128xf32>
    %124 = arith.addf %123, %122 : vector<8x128xf32>
    %125 = arith.divf %123, %124 : vector<8x128xf32>
    %126 = vector.extract_strided_slice %125 {offsets = [0, 0], sizes = [8, 32], strides = [1, 1]} : vector<8x128xf32> to vector<8x32xf32>
    %127 = vector.extract_strided_slice %125 {offsets = [0, 32], sizes = [8, 32], strides = [1, 1]} : vector<8x128xf32> to vector<8x32xf32>
    %128 = vector.extract_strided_slice %125 {offsets = [0, 64], sizes = [8, 32], strides = [1, 1]} : vector<8x128xf32> to vector<8x32xf32>
    %129 = vector.extract_strided_slice %125 {offsets = [0, 96], sizes = [8, 32], strides = [1, 1]} : vector<8x128xf32> to vector<8x32xf32>
    %cst_48 = arith.constant 2.000000e+00 : f32
    %130 = vector.broadcast %cst_48 : f32 to vector<8x32xf32>
    %131 = arith.mulf %130, %129 : vector<8x32xf32>
    %cst_49 = arith.constant 1.000000e+00 : f32
    %132 = vector.broadcast %cst_49 : f32 to vector<8x32xf32>
    %133 = arith.subf %131, %132 : vector<8x32xf32>
    %134 = arith.mulf %127, %108 : vector<8x32xf32>
    %135 = arith.mulf %126, %133 : vector<8x32xf32>
    %136 = arith.addf %134, %135 : vector<8x32xf32>
    %137 = math.tanh %136 : vector<8x32xf32>
    %138 = arith.mulf %128, %137 : vector<8x32xf32>
    %139 = arith.index_cast %c4_i32 : i32 to index
    %c0_50 = arith.constant 0 : index
    %c0_51 = arith.constant 0 : index
    %140 = vector.load %arg12[%139, %c0_50, %c0_51] : memref<8x8x32xf32, #tpu.memory_space<vmem>>, vector<1x8x32xf32>
    %141 = vector.shape_cast %140 : vector<1x8x32xf32> to vector<8x32xf32>
    %142 = vector.shape_cast %138 : vector<8x32xf32> to vector<1x8x32xf32>
    tpu.vector_store %arg12[%139, %c0_50, %c0_51], %142 {strides = array<i32>} : memref<8x8x32xf32, #tpu.memory_space<vmem>>, vector<1x8x32xf32>,
    %c5_i32 = arith.constant 5 : i32
    %143 = arith.index_cast %c5_i32 : i32 to index
    %c0_52 = arith.constant 0 : index
    %c0_53 = arith.constant 0 : index
    %144 = vector.load %arg11[%143, %c0_52, %c0_53] : memref<8x8x128xf32, #tpu.memory_space<vmem>>, vector<1x8x128xf32>
    %145 = vector.shape_cast %144 : vector<1x8x128xf32> to vector<8x128xf32>
    %146 = arith.truncf %138 : vector<8x32xf32> to vector<8x32xbf16>
    %cst_54 = arith.constant dense<0.000000e+00> : vector<8x128xf32>
    %147 = tpu.matmul %146, %1, %cst_54 {dimension_numbers = #tpu.dot_dimension_numbers<[1], [0], [0], [1], [0, 0, 1, 1], [], []>} : vector<8x32xbf16>, vector<32x128xbf16>, vector<8x128xf32> -> vector<8x128xf32>
    %148 = arith.addf %145, %147 : vector<8x128xf32>
    %149 = arith.negf %148 : vector<8x128xf32>
    %150 = math.exp %149 : vector<8x128xf32>
    %cst_55 = arith.constant 1.000000e+00 : f32
    %151 = vector.broadcast %cst_55 : f32 to vector<8x128xf32>
    %152 = arith.addf %151, %150 : vector<8x128xf32>
    %153 = arith.divf %151, %152 : vector<8x128xf32>
    %154 = vector.extract_strided_slice %153 {offsets = [0, 0], sizes = [8, 32], strides = [1, 1]} : vector<8x128xf32> to vector<8x32xf32>
    %155 = vector.extract_strided_slice %153 {offsets = [0, 32], sizes = [8, 32], strides = [1, 1]} : vector<8x128xf32> to vector<8x32xf32>
    %156 = vector.extract_strided_slice %153 {offsets = [0, 64], sizes = [8, 32], strides = [1, 1]} : vector<8x128xf32> to vector<8x32xf32>
    %157 = vector.extract_strided_slice %153 {offsets = [0, 96], sizes = [8, 32], strides = [1, 1]} : vector<8x128xf32> to vector<8x32xf32>
    %cst_56 = arith.constant 2.000000e+00 : f32
    %158 = vector.broadcast %cst_56 : f32 to vector<8x32xf32>
    %159 = arith.mulf %158, %157 : vector<8x32xf32>
    %cst_57 = arith.constant 1.000000e+00 : f32
    %160 = vector.broadcast %cst_57 : f32 to vector<8x32xf32>
    %161 = arith.subf %159, %160 : vector<8x32xf32>
    %162 = arith.mulf %155, %136 : vector<8x32xf32>
    %163 = arith.mulf %154, %161 : vector<8x32xf32>
    %164 = arith.addf %162, %163 : vector<8x32xf32>
    %165 = math.tanh %164 : vector<8x32xf32>
    %166 = arith.mulf %156, %165 : vector<8x32xf32>
    %167 = arith.index_cast %c5_i32 : i32 to index
    %c0_58 = arith.constant 0 : index
    %c0_59 = arith.constant 0 : index
    %168 = vector.load %arg12[%167, %c0_58, %c0_59] : memref<8x8x32xf32, #tpu.memory_space<vmem>>, vector<1x8x32xf32>
    %169 = vector.shape_cast %168 : vector<1x8x32xf32> to vector<8x32xf32>
    %170 = vector.shape_cast %166 : vector<8x32xf32> to vector<1x8x32xf32>
    tpu.vector_store %arg12[%167, %c0_58, %c0_59], %170 {strides = array<i32>} : memref<8x8x32xf32, #tpu.memory_space<vmem>>, vector<1x8x32xf32>,
    %c6_i32 = arith.constant 6 : i32
    %171 = arith.index_cast %c6_i32 : i32 to index
    %c0_60 = arith.constant 0 : index
    %c0_61 = arith.constant 0 : index
    %172 = vector.load %arg11[%171, %c0_60, %c0_61] : memref<8x8x128xf32, #tpu.memory_space<vmem>>, vector<1x8x128xf32>
    %173 = vector.shape_cast %172 : vector<1x8x128xf32> to vector<8x128xf32>
    %174 = arith.truncf %166 : vector<8x32xf32> to vector<8x32xbf16>
    %cst_62 = arith.constant dense<0.000000e+00> : vector<8x128xf32>
    %175 = tpu.matmul %174, %1, %cst_62 {dimension_numbers = #tpu.dot_dimension_numbers<[1], [0], [0], [1], [0, 0, 1, 1], [], []>} : vector<8x32xbf16>, vector<32x128xbf16>, vector<8x128xf32> -> vector<8x128xf32>
    %176 = arith.addf %173, %175 : vector<8x128xf32>
    %177 = arith.negf %176 : vector<8x128xf32>
    %178 = math.exp %177 : vector<8x128xf32>
    %cst_63 = arith.constant 1.000000e+00 : f32
    %179 = vector.broadcast %cst_63 : f32 to vector<8x128xf32>
    %180 = arith.addf %179, %178 : vector<8x128xf32>
    %181 = arith.divf %179, %180 : vector<8x128xf32>
    %182 = vector.extract_strided_slice %181 {offsets = [0, 0], sizes = [8, 32], strides = [1, 1]} : vector<8x128xf32> to vector<8x32xf32>
    %183 = vector.extract_strided_slice %181 {offsets = [0, 32], sizes = [8, 32], strides = [1, 1]} : vector<8x128xf32> to vector<8x32xf32>
    %184 = vector.extract_strided_slice %181 {offsets = [0, 64], sizes = [8, 32], strides = [1, 1]} : vector<8x128xf32> to vector<8x32xf32>
    %185 = vector.extract_strided_slice %181 {offsets = [0, 96], sizes = [8, 32], strides = [1, 1]} : vector<8x128xf32> to vector<8x32xf32>
    %cst_64 = arith.constant 2.000000e+00 : f32
    %186 = vector.broadcast %cst_64 : f32 to vector<8x32xf32>
    %187 = arith.mulf %186, %185 : vector<8x32xf32>
    %cst_65 = arith.constant 1.000000e+00 : f32
    %188 = vector.broadcast %cst_65 : f32 to vector<8x32xf32>
    %189 = arith.subf %187, %188 : vector<8x32xf32>
    %190 = arith.mulf %183, %164 : vector<8x32xf32>
    %191 = arith.mulf %182, %189 : vector<8x32xf32>
    %192 = arith.addf %190, %191 : vector<8x32xf32>
    %193 = math.tanh %192 : vector<8x32xf32>
    %194 = arith.mulf %184, %193 : vector<8x32xf32>
    %195 = arith.index_cast %c6_i32 : i32 to index
    %c0_66 = arith.constant 0 : index
    %c0_67 = arith.constant 0 : index
    %196 = vector.load %arg12[%195, %c0_66, %c0_67] : memref<8x8x32xf32, #tpu.memory_space<vmem>>, vector<1x8x32xf32>
    %197 = vector.shape_cast %196 : vector<1x8x32xf32> to vector<8x32xf32>
    %198 = vector.shape_cast %194 : vector<8x32xf32> to vector<1x8x32xf32>
    tpu.vector_store %arg12[%195, %c0_66, %c0_67], %198 {strides = array<i32>} : memref<8x8x32xf32, #tpu.memory_space<vmem>>, vector<1x8x32xf32>,
    %c7_i32 = arith.constant 7 : i32
    %199 = arith.index_cast %c7_i32 : i32 to index
    %c0_68 = arith.constant 0 : index
    %c0_69 = arith.constant 0 : index
    %200 = vector.load %arg11[%199, %c0_68, %c0_69] : memref<8x8x128xf32, #tpu.memory_space<vmem>>, vector<1x8x128xf32>
    %201 = vector.shape_cast %200 : vector<1x8x128xf32> to vector<8x128xf32>
    %202 = arith.truncf %194 : vector<8x32xf32> to vector<8x32xbf16>
    %cst_70 = arith.constant dense<0.000000e+00> : vector<8x128xf32>
    %203 = tpu.matmul %202, %1, %cst_70 {dimension_numbers = #tpu.dot_dimension_numbers<[1], [0], [0], [1], [0, 0, 1, 1], [], []>} : vector<8x32xbf16>, vector<32x128xbf16>, vector<8x128xf32> -> vector<8x128xf32>
    %204 = arith.addf %201, %203 : vector<8x128xf32>
    %205 = arith.negf %204 : vector<8x128xf32>
    %206 = math.exp %205 : vector<8x128xf32>
    %cst_71 = arith.constant 1.000000e+00 : f32
    %207 = vector.broadcast %cst_71 : f32 to vector<8x128xf32>
    %208 = arith.addf %207, %206 : vector<8x128xf32>
    %209 = arith.divf %207, %208 : vector<8x128xf32>
    %210 = vector.extract_strided_slice %209 {offsets = [0, 0], sizes = [8, 32], strides = [1, 1]} : vector<8x128xf32> to vector<8x32xf32>
    %211 = vector.extract_strided_slice %209 {offsets = [0, 32], sizes = [8, 32], strides = [1, 1]} : vector<8x128xf32> to vector<8x32xf32>
    %212 = vector.extract_strided_slice %209 {offsets = [0, 64], sizes = [8, 32], strides = [1, 1]} : vector<8x128xf32> to vector<8x32xf32>
    %213 = vector.extract_strided_slice %209 {offsets = [0, 96], sizes = [8, 32], strides = [1, 1]} : vector<8x128xf32> to vector<8x32xf32>
    %cst_72 = arith.constant 2.000000e+00 : f32
    %214 = vector.broadcast %cst_72 : f32 to vector<8x32xf32>
    %215 = arith.mulf %214, %213 : vector<8x32xf32>
    %cst_73 = arith.constant 1.000000e+00 : f32
    %216 = vector.broadcast %cst_73 : f32 to vector<8x32xf32>
    %217 = arith.subf %215, %216 : vector<8x32xf32>
    %218 = arith.mulf %211, %192 : vector<8x32xf32>
    %219 = arith.mulf %210, %217 : vector<8x32xf32>
    %220 = arith.addf %218, %219 : vector<8x32xf32>
    %221 = math.tanh %220 : vector<8x32xf32>
    %222 = arith.mulf %212, %221 : vector<8x32xf32>
    %223 = arith.index_cast %c7_i32 : i32 to index
    %c0_74 = arith.constant 0 : index
    %c0_75 = arith.constant 0 : index
    %224 = vector.load %arg12[%223, %c0_74, %c0_75] : memref<8x8x32xf32, #tpu.memory_space<vmem>>, vector<1x8x32xf32>
    %225 = vector.shape_cast %224 : vector<1x8x32xf32> to vector<8x32xf32>
    %226 = vector.shape_cast %222 : vector<8x32xf32> to vector<1x8x32xf32>
    tpu.vector_store %arg12[%223, %c0_74, %c0_75], %226 {strides = array<i32>} : memref<8x8x32xf32, #tpu.memory_space<vmem>>, vector<1x8x32xf32>,
    %c7_i32_76 = arith.constant 7 : i32
    %c0_77 = arith.constant 0 : index
    %c0_78 = arith.constant 0 : index
    %227 = vector.load %arg5[%c0_77, %c0_78] : memref<32x128xbf16, #tpu.memory_space<vmem>>, vector<32x128xbf16>
    %c0_79 = arith.constant 0 : index
    %c0_80 = arith.constant 0 : index
    %228 = vector.load %arg6[%c0_79, %c0_80] : memref<32x128xbf16, #tpu.memory_space<vmem>>, vector<32x128xbf16>
    %c0_81 = arith.constant 0 : index
    %c0_82 = arith.constant 0 : index
    %229 = vector.load %arg7[%c0_81, %c0_82] : memref<1x128xf32, #tpu.memory_space<vmem>>, vector<1x128xf32>
    %c0_83 = arith.constant 0 : index
    %c0_84 = arith.constant 0 : index
    %c0_85 = arith.constant 0 : index
    %230 = vector.load %arg12[%c0_83, %c0_84, %c0_85] : memref<8x8x32xf32, #tpu.memory_space<vmem>>, vector<8x8x32xf32>
    %231 = vector.shape_cast %230 : vector<8x8x32xf32> to vector<64x32xf32>
    %232 = arith.truncf %231 : vector<64x32xf32> to vector<64x32xbf16>
    %cst_86 = arith.constant dense<0.000000e+00> : vector<64x128xf32>
    %233 = tpu.matmul %232, %227, %cst_86 {dimension_numbers = #tpu.dot_dimension_numbers<[1], [0], [0], [1], [0, 0, 1, 1], [], []>} : vector<64x32xbf16>, vector<32x128xbf16>, vector<64x128xf32> -> vector<64x128xf32>
    %234 = vector.broadcast %229 : vector<1x128xf32> to vector<64x128xf32>
    %235 = arith.addf %233, %234 : vector<64x128xf32>
    %236 = vector.shape_cast %235 : vector<64x128xf32> to vector<8x8x128xf32>
    %c0_87 = arith.constant 0 : index
    %c0_88 = arith.constant 0 : index
    %c0_89 = arith.constant 0 : index
    %237 = vector.load %arg11[%c0_87, %c0_88, %c0_89] : memref<8x8x128xf32, #tpu.memory_space<vmem>>, vector<8x8x128xf32>
    tpu.vector_store %arg11[%c0_87, %c0_88, %c0_89], %236 {strides = array<i32>} : memref<8x8x128xf32, #tpu.memory_space<vmem>>, vector<8x8x128xf32>,
    %c0_90 = arith.constant 0 : index
    %c0_91 = arith.constant 0 : index
    %c0_92 = arith.constant 0 : index
    %238 = vector.load %arg11[%c0_90, %c0_91, %c0_92] : memref<8x8x128xf32, #tpu.memory_space<vmem>>, vector<1x8x128xf32>
    %239 = vector.shape_cast %238 : vector<1x8x128xf32> to vector<8x128xf32>
    %240 = arith.negf %239 : vector<8x128xf32>
    %241 = math.exp %240 : vector<8x128xf32>
    %cst_93 = arith.constant 1.000000e+00 : f32
    %242 = vector.broadcast %cst_93 : f32 to vector<8x128xf32>
    %243 = arith.addf %242, %241 : vector<8x128xf32>
    %244 = arith.divf %242, %243 : vector<8x128xf32>
    %245 = vector.extract_strided_slice %244 {offsets = [0, 0], sizes = [8, 32], strides = [1, 1]} : vector<8x128xf32> to vector<8x32xf32>
    %246 = vector.extract_strided_slice %244 {offsets = [0, 96], sizes = [8, 32], strides = [1, 1]} : vector<8x128xf32> to vector<8x32xf32>
    %cst_94 = arith.constant 2.000000e+00 : f32
    %247 = vector.broadcast %cst_94 : f32 to vector<8x32xf32>
    %248 = arith.mulf %247, %246 : vector<8x32xf32>
    %cst_95 = arith.constant 1.000000e+00 : f32
    %249 = vector.broadcast %cst_95 : f32 to vector<8x32xf32>
    %250 = arith.subf %248, %249 : vector<8x32xf32>
    %251 = arith.mulf %245, %250 : vector<8x32xf32>
    %252 = vector.extract_strided_slice %244 {offsets = [0, 64], sizes = [8, 32], strides = [1, 1]} : vector<8x128xf32> to vector<8x32xf32>
    %253 = math.tanh %251 : vector<8x32xf32>
    %254 = arith.mulf %252, %253 : vector<8x32xf32>
    %c1_i32_96 = arith.constant 1 : i32
    %255 = arith.index_cast %c1_i32_96 : i32 to index
    %c0_97 = arith.constant 0 : index
    %c0_98 = arith.constant 0 : index
    %256 = vector.load %arg11[%255, %c0_97, %c0_98] : memref<8x8x128xf32, #tpu.memory_space<vmem>>, vector<1x8x128xf32>
    %257 = vector.shape_cast %256 : vector<1x8x128xf32> to vector<8x128xf32>
    %258 = arith.truncf %254 : vector<8x32xf32> to vector<8x32xbf16>
    %cst_99 = arith.constant dense<0.000000e+00> : vector<8x128xf32>
    %259 = tpu.matmul %258, %228, %cst_99 {dimension_numbers = #tpu.dot_dimension_numbers<[1], [0], [0], [1], [0, 0, 1, 1], [], []>} : vector<8x32xbf16>, vector<32x128xbf16>, vector<8x128xf32> -> vector<8x128xf32>
    %260 = arith.addf %257, %259 : vector<8x128xf32>
    %261 = arith.negf %260 : vector<8x128xf32>
    %262 = math.exp %261 : vector<8x128xf32>
    %cst_100 = arith.constant 1.000000e+00 : f32
    %263 = vector.broadcast %cst_100 : f32 to vector<8x128xf32>
    %264 = arith.addf %263, %262 : vector<8x128xf32>
    %265 = arith.divf %263, %264 : vector<8x128xf32>
    %266 = vector.extract_strided_slice %265 {offsets = [0, 0], sizes = [8, 32], strides = [1, 1]} : vector<8x128xf32> to vector<8x32xf32>
    %267 = vector.extract_strided_slice %265 {offsets = [0, 32], sizes = [8, 32], strides = [1, 1]} : vector<8x128xf32> to vector<8x32xf32>
    %268 = vector.extract_strided_slice %265 {offsets = [0, 64], sizes = [8, 32], strides = [1, 1]} : vector<8x128xf32> to vector<8x32xf32>
    %269 = vector.extract_strided_slice %265 {offsets = [0, 96], sizes = [8, 32], strides = [1, 1]} : vector<8x128xf32> to vector<8x32xf32>
    %cst_101 = arith.constant 2.000000e+00 : f32
    %270 = vector.broadcast %cst_101 : f32 to vector<8x32xf32>
    %271 = arith.mulf %270, %269 : vector<8x32xf32>
    %cst_102 = arith.constant 1.000000e+00 : f32
    %272 = vector.broadcast %cst_102 : f32 to vector<8x32xf32>
    %273 = arith.subf %271, %272 : vector<8x32xf32>
    %274 = arith.mulf %267, %251 : vector<8x32xf32>
    %275 = arith.mulf %266, %273 : vector<8x32xf32>
    %276 = arith.addf %274, %275 : vector<8x32xf32>
    %277 = math.tanh %276 : vector<8x32xf32>
    %278 = arith.mulf %268, %277 : vector<8x32xf32>
    %c2_i32_103 = arith.constant 2 : i32
    %279 = arith.index_cast %c2_i32_103 : i32 to index
    %c0_104 = arith.constant 0 : index
    %c0_105 = arith.constant 0 : index
    %280 = vector.load %arg11[%279, %c0_104, %c0_105] : memref<8x8x128xf32, #tpu.memory_space<vmem>>, vector<1x8x128xf32>
    %281 = vector.shape_cast %280 : vector<1x8x128xf32> to vector<8x128xf32>
    %282 = arith.truncf %278 : vector<8x32xf32> to vector<8x32xbf16>
    %cst_106 = arith.constant dense<0.000000e+00> : vector<8x128xf32>
    %283 = tpu.matmul %282, %228, %cst_106 {dimension_numbers = #tpu.dot_dimension_numbers<[1], [0], [0], [1], [0, 0, 1, 1], [], []>} : vector<8x32xbf16>, vector<32x128xbf16>, vector<8x128xf32> -> vector<8x128xf32>
    %284 = arith.addf %281, %283 : vector<8x128xf32>
    %285 = arith.negf %284 : vector<8x128xf32>
    %286 = math.exp %285 : vector<8x128xf32>
    %cst_107 = arith.constant 1.000000e+00 : f32
    %287 = vector.broadcast %cst_107 : f32 to vector<8x128xf32>
    %288 = arith.addf %287, %286 : vector<8x128xf32>
    %289 = arith.divf %287, %288 : vector<8x128xf32>
    %290 = vector.extract_strided_slice %289 {offsets = [0, 0], sizes = [8, 32], strides = [1, 1]} : vector<8x128xf32> to vector<8x32xf32>
    %291 = vector.extract_strided_slice %289 {offsets = [0, 32], sizes = [8, 32], strides = [1, 1]} : vector<8x128xf32> to vector<8x32xf32>
    %292 = vector.extract_strided_slice %289 {offsets = [0, 64], sizes = [8, 32], strides = [1, 1]} : vector<8x128xf32> to vector<8x32xf32>
    %293 = vector.extract_strided_slice %289 {offsets = [0, 96], sizes = [8, 32], strides = [1, 1]} : vector<8x128xf32> to vector<8x32xf32>
    %cst_108 = arith.constant 2.000000e+00 : f32
    %294 = vector.broadcast %cst_108 : f32 to vector<8x32xf32>
    %295 = arith.mulf %294, %293 : vector<8x32xf32>
    %cst_109 = arith.constant 1.000000e+00 : f32
    %296 = vector.broadcast %cst_109 : f32 to vector<8x32xf32>
    %297 = arith.subf %295, %296 : vector<8x32xf32>
    %298 = arith.mulf %291, %276 : vector<8x32xf32>
    %299 = arith.mulf %290, %297 : vector<8x32xf32>
    %300 = arith.addf %298, %299 : vector<8x32xf32>
    %301 = math.tanh %300 : vector<8x32xf32>
    %302 = arith.mulf %292, %301 : vector<8x32xf32>
    %c3_i32_110 = arith.constant 3 : i32
    %303 = arith.index_cast %c3_i32_110 : i32 to index
    %c0_111 = arith.constant 0 : index
    %c0_112 = arith.constant 0 : index
    %304 = vector.load %arg11[%303, %c0_111, %c0_112] : memref<8x8x128xf32, #tpu.memory_space<vmem>>, vector<1x8x128xf32>
    %305 = vector.shape_cast %304 : vector<1x8x128xf32> to vector<8x128xf32>
    %306 = arith.truncf %302 : vector<8x32xf32> to vector<8x32xbf16>
    %cst_113 = arith.constant dense<0.000000e+00> : vector<8x128xf32>
    %307 = tpu.matmul %306, %228, %cst_113 {dimension_numbers = #tpu.dot_dimension_numbers<[1], [0], [0], [1], [0, 0, 1, 1], [], []>} : vector<8x32xbf16>, vector<32x128xbf16>, vector<8x128xf32> -> vector<8x128xf32>
    %308 = arith.addf %305, %307 : vector<8x128xf32>
    %309 = arith.negf %308 : vector<8x128xf32>
    %310 = math.exp %309 : vector<8x128xf32>
    %cst_114 = arith.constant 1.000000e+00 : f32
    %311 = vector.broadcast %cst_114 : f32 to vector<8x128xf32>
    %312 = arith.addf %311, %310 : vector<8x128xf32>
    %313 = arith.divf %311, %312 : vector<8x128xf32>
    %314 = vector.extract_strided_slice %313 {offsets = [0, 0], sizes = [8, 32], strides = [1, 1]} : vector<8x128xf32> to vector<8x32xf32>
    %315 = vector.extract_strided_slice %313 {offsets = [0, 32], sizes = [8, 32], strides = [1, 1]} : vector<8x128xf32> to vector<8x32xf32>
    %316 = vector.extract_strided_slice %313 {offsets = [0, 64], sizes = [8, 32], strides = [1, 1]} : vector<8x128xf32> to vector<8x32xf32>
    %317 = vector.extract_strided_slice %313 {offsets = [0, 96], sizes = [8, 32], strides = [1, 1]} : vector<8x128xf32> to vector<8x32xf32>
    %cst_115 = arith.constant 2.000000e+00 : f32
    %318 = vector.broadcast %cst_115 : f32 to vector<8x32xf32>
    %319 = arith.mulf %318, %317 : vector<8x32xf32>
    %cst_116 = arith.constant 1.000000e+00 : f32
    %320 = vector.broadcast %cst_116 : f32 to vector<8x32xf32>
    %321 = arith.subf %319, %320 : vector<8x32xf32>
    %322 = arith.mulf %315, %300 : vector<8x32xf32>
    %323 = arith.mulf %314, %321 : vector<8x32xf32>
    %324 = arith.addf %322, %323 : vector<8x32xf32>
    %325 = math.tanh %324 : vector<8x32xf32>
    %326 = arith.mulf %316, %325 : vector<8x32xf32>
    %c4_i32_117 = arith.constant 4 : i32
    %327 = arith.index_cast %c4_i32_117 : i32 to index
    %c0_118 = arith.constant 0 : index
    %c0_119 = arith.constant 0 : index
    %328 = vector.load %arg11[%327, %c0_118, %c0_119] : memref<8x8x128xf32, #tpu.memory_space<vmem>>, vector<1x8x128xf32>
    %329 = vector.shape_cast %328 : vector<1x8x128xf32> to vector<8x128xf32>
    %330 = arith.truncf %326 : vector<8x32xf32> to vector<8x32xbf16>
    %cst_120 = arith.constant dense<0.000000e+00> : vector<8x128xf32>
    %331 = tpu.matmul %330, %228, %cst_120 {dimension_numbers = #tpu.dot_dimension_numbers<[1], [0], [0], [1], [0, 0, 1, 1], [], []>} : vector<8x32xbf16>, vector<32x128xbf16>, vector<8x128xf32> -> vector<8x128xf32>
    %332 = arith.addf %329, %331 : vector<8x128xf32>
    %333 = arith.negf %332 : vector<8x128xf32>
    %334 = math.exp %333 : vector<8x128xf32>
    %cst_121 = arith.constant 1.000000e+00 : f32
    %335 = vector.broadcast %cst_121 : f32 to vector<8x128xf32>
    %336 = arith.addf %335, %334 : vector<8x128xf32>
    %337 = arith.divf %335, %336 : vector<8x128xf32>
    %338 = vector.extract_strided_slice %337 {offsets = [0, 0], sizes = [8, 32], strides = [1, 1]} : vector<8x128xf32> to vector<8x32xf32>
    %339 = vector.extract_strided_slice %337 {offsets = [0, 32], sizes = [8, 32], strides = [1, 1]} : vector<8x128xf32> to vector<8x32xf32>
    %340 = vector.extract_strided_slice %337 {offsets = [0, 64], sizes = [8, 32], strides = [1, 1]} : vector<8x128xf32> to vector<8x32xf32>
    %341 = vector.extract_strided_slice %337 {offsets = [0, 96], sizes = [8, 32], strides = [1, 1]} : vector<8x128xf32> to vector<8x32xf32>
    %cst_122 = arith.constant 2.000000e+00 : f32
    %342 = vector.broadcast %cst_122 : f32 to vector<8x32xf32>
    %343 = arith.mulf %342, %341 : vector<8x32xf32>
    %cst_123 = arith.constant 1.000000e+00 : f32
    %344 = vector.broadcast %cst_123 : f32 to vector<8x32xf32>
    %345 = arith.subf %343, %344 : vector<8x32xf32>
    %346 = arith.mulf %339, %324 : vector<8x32xf32>
    %347 = arith.mulf %338, %345 : vector<8x32xf32>
    %348 = arith.addf %346, %347 : vector<8x32xf32>
    %349 = math.tanh %348 : vector<8x32xf32>
    %350 = arith.mulf %340, %349 : vector<8x32xf32>
    %c5_i32_124 = arith.constant 5 : i32
    %351 = arith.index_cast %c5_i32_124 : i32 to index
    %c0_125 = arith.constant 0 : index
    %c0_126 = arith.constant 0 : index
    %352 = vector.load %arg11[%351, %c0_125, %c0_126] : memref<8x8x128xf32, #tpu.memory_space<vmem>>, vector<1x8x128xf32>
    %353 = vector.shape_cast %352 : vector<1x8x128xf32> to vector<8x128xf32>
    %354 = arith.truncf %350 : vector<8x32xf32> to vector<8x32xbf16>
    %cst_127 = arith.constant dense<0.000000e+00> : vector<8x128xf32>
    %355 = tpu.matmul %354, %228, %cst_127 {dimension_numbers = #tpu.dot_dimension_numbers<[1], [0], [0], [1], [0, 0, 1, 1], [], []>} : vector<8x32xbf16>, vector<32x128xbf16>, vector<8x128xf32> -> vector<8x128xf32>
    %356 = arith.addf %353, %355 : vector<8x128xf32>
    %357 = arith.negf %356 : vector<8x128xf32>
    %358 = math.exp %357 : vector<8x128xf32>
    %cst_128 = arith.constant 1.000000e+00 : f32
    %359 = vector.broadcast %cst_128 : f32 to vector<8x128xf32>
    %360 = arith.addf %359, %358 : vector<8x128xf32>
    %361 = arith.divf %359, %360 : vector<8x128xf32>
    %362 = vector.extract_strided_slice %361 {offsets = [0, 0], sizes = [8, 32], strides = [1, 1]} : vector<8x128xf32> to vector<8x32xf32>
    %363 = vector.extract_strided_slice %361 {offsets = [0, 32], sizes = [8, 32], strides = [1, 1]} : vector<8x128xf32> to vector<8x32xf32>
    %364 = vector.extract_strided_slice %361 {offsets = [0, 64], sizes = [8, 32], strides = [1, 1]} : vector<8x128xf32> to vector<8x32xf32>
    %365 = vector.extract_strided_slice %361 {offsets = [0, 96], sizes = [8, 32], strides = [1, 1]} : vector<8x128xf32> to vector<8x32xf32>
    %cst_129 = arith.constant 2.000000e+00 : f32
    %366 = vector.broadcast %cst_129 : f32 to vector<8x32xf32>
    %367 = arith.mulf %366, %365 : vector<8x32xf32>
    %cst_130 = arith.constant 1.000000e+00 : f32
    %368 = vector.broadcast %cst_130 : f32 to vector<8x32xf32>
    %369 = arith.subf %367, %368 : vector<8x32xf32>
    %370 = arith.mulf %363, %348 : vector<8x32xf32>
    %371 = arith.mulf %362, %369 : vector<8x32xf32>
    %372 = arith.addf %370, %371 : vector<8x32xf32>
    %373 = math.tanh %372 : vector<8x32xf32>
    %374 = arith.mulf %364, %373 : vector<8x32xf32>
    %c6_i32_131 = arith.constant 6 : i32
    %375 = arith.index_cast %c6_i32_131 : i32 to index
    %c0_132 = arith.constant 0 : index
    %c0_133 = arith.constant 0 : index
    %376 = vector.load %arg11[%375, %c0_132, %c0_133] : memref<8x8x128xf32, #tpu.memory_space<vmem>>, vector<1x8x128xf32>
    %377 = vector.shape_cast %376 : vector<1x8x128xf32> to vector<8x128xf32>
    %378 = arith.truncf %374 : vector<8x32xf32> to vector<8x32xbf16>
    %cst_134 = arith.constant dense<0.000000e+00> : vector<8x128xf32>
    %379 = tpu.matmul %378, %228, %cst_134 {dimension_numbers = #tpu.dot_dimension_numbers<[1], [0], [0], [1], [0, 0, 1, 1], [], []>} : vector<8x32xbf16>, vector<32x128xbf16>, vector<8x128xf32> -> vector<8x128xf32>
    %380 = arith.addf %377, %379 : vector<8x128xf32>
    %381 = arith.negf %380 : vector<8x128xf32>
    %382 = math.exp %381 : vector<8x128xf32>
    %cst_135 = arith.constant 1.000000e+00 : f32
    %383 = vector.broadcast %cst_135 : f32 to vector<8x128xf32>
    %384 = arith.addf %383, %382 : vector<8x128xf32>
    %385 = arith.divf %383, %384 : vector<8x128xf32>
    %386 = vector.extract_strided_slice %385 {offsets = [0, 0], sizes = [8, 32], strides = [1, 1]} : vector<8x128xf32> to vector<8x32xf32>
    %387 = vector.extract_strided_slice %385 {offsets = [0, 32], sizes = [8, 32], strides = [1, 1]} : vector<8x128xf32> to vector<8x32xf32>
    %388 = vector.extract_strided_slice %385 {offsets = [0, 64], sizes = [8, 32], strides = [1, 1]} : vector<8x128xf32> to vector<8x32xf32>
    %389 = vector.extract_strided_slice %385 {offsets = [0, 96], sizes = [8, 32], strides = [1, 1]} : vector<8x128xf32> to vector<8x32xf32>
    %cst_136 = arith.constant 2.000000e+00 : f32
    %390 = vector.broadcast %cst_136 : f32 to vector<8x32xf32>
    %391 = arith.mulf %390, %389 : vector<8x32xf32>
    %cst_137 = arith.constant 1.000000e+00 : f32
    %392 = vector.broadcast %cst_137 : f32 to vector<8x32xf32>
    %393 = arith.subf %391, %392 : vector<8x32xf32>
    %394 = arith.mulf %387, %372 : vector<8x32xf32>
    %395 = arith.mulf %386, %393 : vector<8x32xf32>
    %396 = arith.addf %394, %395 : vector<8x32xf32>
    %397 = math.tanh %396 : vector<8x32xf32>
    %398 = arith.mulf %388, %397 : vector<8x32xf32>
    %c7_i32_138 = arith.constant 7 : i32
    %399 = arith.index_cast %c7_i32_138 : i32 to index
    %c0_139 = arith.constant 0 : index
    %c0_140 = arith.constant 0 : index
    %400 = vector.load %arg11[%399, %c0_139, %c0_140] : memref<8x8x128xf32, #tpu.memory_space<vmem>>, vector<1x8x128xf32>
    %401 = vector.shape_cast %400 : vector<1x8x128xf32> to vector<8x128xf32>
    %402 = arith.truncf %398 : vector<8x32xf32> to vector<8x32xbf16>
    %cst_141 = arith.constant dense<0.000000e+00> : vector<8x128xf32>
    %403 = tpu.matmul %402, %228, %cst_141 {dimension_numbers = #tpu.dot_dimension_numbers<[1], [0], [0], [1], [0, 0, 1, 1], [], []>} : vector<8x32xbf16>, vector<32x128xbf16>, vector<8x128xf32> -> vector<8x128xf32>
    %404 = arith.addf %401, %403 : vector<8x128xf32>
    %405 = arith.negf %404 : vector<8x128xf32>
    %406 = math.exp %405 : vector<8x128xf32>
    %cst_142 = arith.constant 1.000000e+00 : f32
    %407 = vector.broadcast %cst_142 : f32 to vector<8x128xf32>
    %408 = arith.addf %407, %406 : vector<8x128xf32>
    %409 = arith.divf %407, %408 : vector<8x128xf32>
    %410 = vector.extract_strided_slice %409 {offsets = [0, 0], sizes = [8, 32], strides = [1, 1]} : vector<8x128xf32> to vector<8x32xf32>
    %411 = vector.extract_strided_slice %409 {offsets = [0, 32], sizes = [8, 32], strides = [1, 1]} : vector<8x128xf32> to vector<8x32xf32>
    %412 = vector.extract_strided_slice %409 {offsets = [0, 64], sizes = [8, 32], strides = [1, 1]} : vector<8x128xf32> to vector<8x32xf32>
    %413 = vector.extract_strided_slice %409 {offsets = [0, 96], sizes = [8, 32], strides = [1, 1]} : vector<8x128xf32> to vector<8x32xf32>
    %cst_143 = arith.constant 2.000000e+00 : f32
    %414 = vector.broadcast %cst_143 : f32 to vector<8x32xf32>
    %415 = arith.mulf %414, %413 : vector<8x32xf32>
    %cst_144 = arith.constant 1.000000e+00 : f32
    %416 = vector.broadcast %cst_144 : f32 to vector<8x32xf32>
    %417 = arith.subf %415, %416 : vector<8x32xf32>
    %418 = arith.mulf %411, %396 : vector<8x32xf32>
    %419 = arith.mulf %410, %417 : vector<8x32xf32>
    %420 = arith.addf %418, %419 : vector<8x32xf32>
    %421 = math.tanh %420 : vector<8x32xf32>
    %422 = arith.mulf %412, %421 : vector<8x32xf32>
    %c7_i32_145 = arith.constant 7 : i32
    %c0_146 = arith.constant 0 : index
    %c0_147 = arith.constant 0 : index
    %423 = vector.load %arg8[%c0_146, %c0_147] : memref<32x128xbf16, #tpu.memory_space<vmem>>, vector<32x128xbf16>
    %c0_148 = arith.constant 0 : index
    %c0_149 = arith.constant 0 : index
    %424 = vector.load %arg9[%c0_148, %c0_149] : memref<1x128xf32, #tpu.memory_space<vmem>>, vector<1x128xf32>
    %425 = arith.truncf %422 : vector<8x32xf32> to vector<8x32xbf16>
    %cst_150 = arith.constant dense<0.000000e+00> : vector<8x128xf32>
    %426 = tpu.matmul %425, %423, %cst_150 {dimension_numbers = #tpu.dot_dimension_numbers<[1], [0], [0], [1], [0, 0, 1, 1], [], []>} : vector<8x32xbf16>, vector<32x128xbf16>, vector<8x128xf32> -> vector<8x128xf32>
    %427 = vector.broadcast %424 : vector<1x128xf32> to vector<8x128xf32>
    %428 = arith.addf %426, %427 : vector<8x128xf32>
    %c0_151 = arith.constant 0 : index
    %c0_152 = arith.constant 0 : index
    %429 = vector.load %arg10[%c0_151, %c0_152] : memref<8x128xf32, #tpu.memory_space<vmem>>, vector<8x128xf32>
    tpu.vector_store %arg10[%c0_151, %c0_152], %428 {strides = array<i32>} : memref<8x128xf32, #tpu.memory_space<vmem>>, vector<8x128xf32>,
    return
  }
  func.func @transform_0(%arg0: i32) -> (i32, i32, i32) {
    %c0_i32 = arith.constant 0 : i32
    %c0_i32_0 = arith.constant 0 : i32
    %c0_i32_1 = arith.constant 0 : i32
    return %c0_i32, %arg0, %c0_i32_0 : i32, i32, i32
  }
  func.func @transform_1(%arg0: i32) -> (i32, i32) {
    %c0_i32 = arith.constant 0 : i32
    %c0_i32_0 = arith.constant 0 : i32
    %c0_i32_1 = arith.constant 0 : i32
    return %c0_i32, %c0_i32_0 : i32, i32
  }
  func.func @transform_2(%arg0: i32) -> (i32, i32) {
    %c0_i32 = arith.constant 0 : i32
    %c0_i32_0 = arith.constant 0 : i32
    %c0_i32_1 = arith.constant 0 : i32
    return %c0_i32, %c0_i32_0 : i32, i32
  }
  func.func @transform_3(%arg0: i32) -> (i32, i32) {
    %c0_i32 = arith.constant 0 : i32
    %c0_i32_0 = arith.constant 0 : i32
    %c0_i32_1 = arith.constant 0 : i32
    return %c0_i32, %c0_i32_0 : i32, i32
  }
  func.func @transform_4(%arg0: i32) -> (i32, i32) {
    %c0_i32 = arith.constant 0 : i32
    %c0_i32_0 = arith.constant 0 : i32
    %c0_i32_1 = arith.constant 0 : i32
    return %c0_i32, %c0_i32_0 : i32, i32
  }
  func.func @transform_5(%arg0: i32) -> (i32, i32) {
    %c0_i32 = arith.constant 0 : i32
    %c0_i32_0 = arith.constant 0 : i32
    %c0_i32_1 = arith.constant 0 : i32
    return %c0_i32, %c0_i32_0 : i32, i32
  }
  func.func @transform_6(%arg0: i32) -> (i32, i32) {
    %c0_i32 = arith.constant 0 : i32
    %c0_i32_0 = arith.constant 0 : i32
    %c0_i32_1 = arith.constant 0 : i32
    return %c0_i32, %c0_i32_0 : i32, i32
  }
  func.func @transform_7(%arg0: i32) -> (i32, i32) {
    %c0_i32 = arith.constant 0 : i32
    %c0_i32_0 = arith.constant 0 : i32
    %c0_i32_1 = arith.constant 0 : i32
    return %c0_i32, %c0_i32_0 : i32, i32
  }
  func.func @transform_8(%arg0: i32) -> (i32, i32) {
    %c0_i32 = arith.constant 0 : i32
    %c0_i32_0 = arith.constant 0 : i32
    %c0_i32_1 = arith.constant 0 : i32
    return %c0_i32, %c0_i32_0 : i32, i32
  }
  func.func @transform_9(%arg0: i32) -> (i32, i32) {
    %c0_i32 = arith.constant 0 : i32
    %c0_i32_0 = arith.constant 0 : i32
    return %arg0, %c0_i32 : i32, i32
  }
}

</mosaic_0001>

<bundles_post_ra>
// kernel: lstm_forward.1
= control target key start
LH: loop header
LB: loop body
LE: loop exit
PB: predicated region body
PF: predicated region fallthrough
CT: control target
= control target key end

     0   :  { %vm88_vm0 = vcmask 523264   ;;  %v1926_v22 = vmov 0.0   ;;  %vm1927_vm1 = vmmov 0   ;;  %s1928_s30 = smov 64   ;;  %vm198_vm2 = vcmask 261120   ;;  %s2339_s1 = inlined_call_operand.vmem [shape: bf16[64,128], index: 1, kind: input, shape index: {}]   ;;  %s2340_s0 = inlined_call_operand.vmem [shape: f32[8,8,64], index: 0, kind: input, shape index: {}]   ;;  %s2341_s3 = inlined_call_operand.vmem [shape: f32[1,128], index: 3, kind: input, shape index: {}]   ;;  %s2342_s2 = inlined_call_operand.vmem [shape: bf16[32,128], index: 2, kind: input, shape index: {}]   ;;  %s2343_s4 = inlined_call_operand.vmem [shape: bf16[32,128], index: 4, kind: input, shape index: {}]   ;;  %s2344_s6 = inlined_call_operand.vmem [shape: f32[1,128], index: 6, kind: input, shape index: {}]   ;;  %s2345_s5 = inlined_call_operand.vmem [shape: bf16[32,128], index: 5, kind: input, shape index: {}]   ;;  %s2346_s7 = inlined_call_operand.vmem [shape: bf16[32,128], index: 7, kind: input, shape index: {}]   ;;  %s2347_s8 = inlined_call_operand.vmem [shape: f32[1,128], index: 8, kind: input, shape index: {}]   ;;  %s2348_s9 = inlined_call_operand.vmem [shape: f32[8,128], index: 9, kind: output, shape index: {}]  }
   0x1   :  { %v1817_v0 = vld [vmem:[%s2339_s1 + $0x18] sm:$0xff]   ;;  %v1818_v1 = vld [vmem:[%s2339_s1 + $0x10] sm:$0xff]   ;;  %v1819_v2 = vld [vmem:[%s2339_s1 + $0x8] sm:$0xff]   ;;  %1681 = vmatprep.subr.bf16.mxu1 %v1926_v22  ;;  %1685 = vmatprep.mubr.msk.bf16.mxu1 %vm1927_vm1, %v1926_v22 }
   0x2   :  { %1665 = vmatprep.subr.bf16.mxu0 %v1817_v0  ;;  %v46_v3 = vld [vmem:[%s2340_s0] sm:$0xff]  ;;  %v47_v4 = vld [vmem:[%s2340_s0 + $0x8] sm:$0xff]  ;;  %v48_v7 = vld [vmem:[%s2340_s0 + $0x10] sm:$0xff] }
   0x3   :  { %1666 = vmatpush3.bf16.msra.mxu0 %v1817_v0  ;;  %v54_v5 = vpack.c.bf16 %v47_v4, %v46_v3  ;;  %v1820_v6 = vld [vmem:[%s2339_s1] sm:$0xff]   ;;  %v49_v8 = vld [vmem:[%s2340_s0 + $0x18] sm:$0xff]  ;;  %s1925_s1 = smov 32   ;;  %v2018_v23 = vld [vmem:[%s2342_s2 + $0x8] sm:$0xff]  }
   0x4   :  { %1667 = vmatprep.subr.bf16.mxu0 %v1818_v1  ;;  %v55_v9 = vpack.c.bf16 %v49_v8, %v48_v7  ;;  %v2010_v11 = vld [vmem:[%s2341_s3] ss:$0 sm:$0xff]  ;;  %1682 = vmatpush3.bf16.msra.mxu1 %v2018_v23 }
   0x5   :  { %1673 = vmatprep.mubr.msk.bf16.mxu0 %vm88_vm0, %v54_v5  ;;  %v2027_v24 = vld [vmem:[%s2342_s2] sm:$0xff]   ;;  %1683 = vmatprep.subr.bf16.mxu1 %v1926_v22 }
   0x7   :  { %1668 = vmatpush3.bf16.msra.mxu0 %v1818_v1 }
   0x8   :  { %1669 = vmatprep.subr.bf16.mxu0 %v1819_v2  ;;  %1684 = vmatpush3.bf16.msra.mxu1 %v2027_v24 }
   0x9   :  { %1689 = vmatprep.subr.bf16.mxu1 %v1926_v22 }
   0xb   :  { %1670 = vmatpush3.bf16.msra.mxu0 %v1819_v2 }
   0xc   :  { %1671 = vmatprep.subr.bf16.mxu0 %v1820_v6 }
   0xf   :  { %1672 = vmatpush3.bf16.msra.mxu0 %v1820_v6 }
  0x10   :  { %1705 = vmatprep.subr.bf16.mxu0 %v1926_v22 }
  0x12   :  { %1674 = vmatmul.mubr.msk.bf16.vlgmr.msra.gmra.mxu0 %vm88_vm0, %v55_v9 }
  0x13   :  { %1706 = vmatpush3.bf16.msra.mxu0 %v2018_v23 }
  0x14   :  { %1707 = vmatprep.subr.bf16.mxu0 %v1926_v22 }
  0x17   :  { %1708 = vmatpush3.bf16.msra.mxu0 %v2027_v24 }
  0x18   :  { %1721 = vmatprep.subr.bf16.mxu0 %v1926_v22 }
  0xd2   :  { %v2005_v10 = vpop.f32.mrf.mxu0 }
  0xd3   :  { %v144_v55 = vadd.f32 %v2005_v10, %v2010_v11 }
  0xd4   :  { %v135_v12 = vpop.f32.mrf.mxu0 }
  0xd5   :  { %v136_v13 = vadd.f32 %v2010_v11, %v135_v12 }
  0xd6   :  { %v2050_v30 = vpop.f32.mrf.mxu0 }
  0xd7   :  { %v1545_v14 = vmul.f32 -1.442695, %v136_v13 }
  0xd8   :  { %v138_v31 = vpop.f32.mrf.mxu0 }
  0xd9   :  { %1829 = vpow2.f32 %v1545_v14  ;;  %v139_v32 = vadd.f32 %v2010_v11, %v138_v31  ;;  %v147_v14 = vadd.f32 %v2050_v30, %v2010_v11 }
  0xe6   :  { %v1830_v15 = vpop.eup %1829 }
  0xe7   :  { %v178_v16 = vadd.f32 1.0, %v1830_v15 }
  0xe9   :  { %1831 = vrcp.f32 %v178_v16 }
  0xf6   :  { %v1832_v17 = vpop.eup %1831 }
  0xf7   :  { %v181_v18 = vmul.f32 2.0, %v1832_v17 }
  0xf9   :  { %v1546_v19 = vadd.f32 -1.0, %v181_v18 }
  0xfb   :  { %184 = vrot.lane.b32.xlu0 %v1546_v19, %s1925_s1 }
 0x16d   :  { %v185_v20 = vpop.permute.xlu0 %184 }
 0x16e   :  { %v187_v21 = vmul.f32 %v1832_v17, %v185_v20 }
 0x170   :  { %1833 = vtanh.f32 %v187_v21 }
 0x17d   :  { %v1834_v25 = vpop.eup %1833 }
 0x17e   :  { %190 = vrot.lane.b32.xlu0 %v1834_v25, %s1928_s30 }
 0x182   :  { %271 = vrot.lane.b32.xlu0 %v187_v21, %s1925_s1 }
 0x1f0   :  { %v191_v26 = vpop.permute.xlu0 %190 }
 0x1f1   :  { %v2038_v27 = vmul.f32 %v1832_v17, %v191_v26 }
 0x1f3   :  { %v202_v28 = vpack.c.bf16 %v2038_v27, %v2038_v27 }
 0x1f4   :  { %v272_v46 = vpop.permute.xlu0 %271 }
 0x1f5   :  { %204 = vrot.lane.b32.xlu1 %v202_v28, %s1928_s30 }
 0x267   :  { %v205_v29 = vpop.permute.xlu1 %204 }
 0x268   :  { %1686 = vmatmul.mubr.msk.bf16.vlgmr.msra.gmra.mxu1 %vm198_vm2, %v205_v29 }
 0x269   :  { %1690 = vmatpush3.bf16.msra.mxu1 %v2018_v23  ;;  %1693 = vmatprep.mubr.msk.bf16.mxu1 %vm1927_vm1, %v1926_v22 }
 0x26a   :  { %1691 = vmatprep.subr.bf16.mxu1 %v1926_v22 }
 0x26d   :  { %1692 = vmatpush3.bf16.msra.mxu1 %v2027_v24 }
 0x26e   :  { %1697 = vmatprep.subr.bf16.mxu1 %v1926_v22 }
 0x328   :  { %v255_v33 = vpop.f32.mrf.mxu1 }
 0x329   :  { %v261_v34 = vadd.f32 %v255_v33, %v139_v32 }
 0x32a   :  { %v1687_v35 = vpop.f32.mrf.mxu1 }
 0x32b   :  { %v1550_v36 = vmul.f32 -1.442695, %v261_v34  ;;  %v50_v35 = vld [vmem:[%s2340_s0 + $0x20] sm:$0xff] }
 0x32c   :  { %v258_v37 = vpop.f32.mrf.mxu1 }
 0x32d   :  { %1835 = vpow2.f32 %v1550_v36  ;;  %v51_v36 = vld [vmem:[%s2340_s0 + $0x28] sm:$0xff]  ;;  %v52_v37 = vld [vmem:[%s2340_s0 + $0x30] sm:$0xff] }
 0x32e   :  { %v1688_v38 = vpop.f32.mrf.mxu1 }
 0x32f   :  { %v56_v38 = vpack.c.bf16 %v51_v36, %v50_v35 }
 0x331   :  { %1677 = vmatprep.mubr.msk.bf16.mxu0 %vm88_vm0, %v56_v38 }
 0x33a   :  { %v1836_v39 = vpop.eup %1835 }
 0x33b   :  { %v265_v40 = vadd.f32 1.0, %v1836_v39  ;;  %v53_v39 = vld [vmem:[%s2340_s0 + $0x38] sm:$0xff] }
 0x33d   :  { %1837 = vrcp.f32 %v265_v40  ;;  %v57_v40 = vpack.c.bf16 %v53_v39, %v52_v37 }
 0x33f   :  { %1678 = vmatmul.mubr.msk.bf16.gmra.mxu0 %vm88_vm0, %v57_v40 }
 0x340   :  { %1709 = vmatprep.mubr.msk.bf16.mxu0 %vm1927_vm1, %v1926_v22 }
 0x34a   :  { %v1838_v41 = vpop.eup %1837 }
 0x34b   :  { %v268_v42 = vmul.f32 2.0, %v1838_v41  ;;  %v274_v47 = vmul.f32 %v1838_v41, %v272_v46 }
 0x34d   :  { %v1551_v43 = vadd.f32 -1.0, %v268_v42 }
 0x34f   :  { %276 = vrot.lane.b32.xlu1 %v1551_v43, %s1925_s1 }
 0x3c1   :  { %v277_v44 = vpop.permute.xlu1 %276 }
 0x3c2   :  { %v279_v45 = vmul.f32 %v1838_v41, %v277_v44 }
 0x3c4   :  { %281 = vrot.lane.b32.xlu1 %v279_v45, %s1925_s1 }
 0x3ff   :  { %v2117_v46 = vpop.f32.mrf.mxu0 }
 0x436   :  { %v282_v48 = vpop.permute.xlu1 %281 }
 0x437   :  { %v284_v49 = vadd.f32 %v282_v48, %v274_v47  ;;  %v151_v47 = vpop.f32.mrf.mxu0 }
 0x439   :  { %1839 = vtanh.f32 %v284_v49  ;;  %v2119_v48 = vpop.f32.mrf.mxu0 }
 0x446   :  { %v1840_v50 = vpop.eup %1839 }
 0x447   :  { %287 = vrot.lane.b32.xlu0 %v1840_v50, %s1925_s1  ;;  %v152_v50 = vadd.f32 %v2010_v11, %v151_v47 }
 0x4b9   :  { %v288_v51 = vpop.permute.xlu0 %287 }
 0x4ba   :  { %v2056_v52 = vmul.f32 %v1838_v41, %v288_v51 }
 0x4bc   :  { %v299_v53 = vpack.c.bf16 %v2056_v52, %v2056_v52 }
 0x4be   :  { %301 = vrot.lane.b32.xlu1 %v299_v53, %s1928_s30 }
 0x530   :  { %v302_v54 = vpop.permute.xlu1 %301 }
 0x531   :  { %1694 = vmatmul.mubr.msk.bf16.vlgmr.msra.gmra.mxu1 %vm198_vm2, %v302_v54 }
 0x532   :  { %1698 = vmatpush3.bf16.msra.mxu1 %v2018_v23  ;;  %1701 = vmatprep.mubr.msk.bf16.mxu1 %vm1927_vm1, %v1926_v22 }
 0x533   :  { %1699 = vmatprep.subr.bf16.mxu1 %v1926_v22 }
 0x536   :  { %1700 = vmatpush3.bf16.msra.mxu1 %v2027_v24 }
 0x537   :  { %1713 = vmatprep.subr.bf16.mxu1 %v1926_v22 }
 0x5f1   :  { %v340_v56 = vpop.f32.mrf.mxu1 }
 0x5f2   :  { %v346_v57 = vadd.f32 %v340_v56, %v144_v55 }
 0x5f3   :  { %v1695_v58 = vpop.f32.mrf.mxu1 }
 0x5f4   :  { %v1553_v59 = vmul.f32 -1.442695, %v346_v57 }
 0x5f5   :  { %v343_v60 = vpop.f32.mrf.mxu1 }
 0x5f6   :  { %1841 = vpow2.f32 %v1553_v59 }
 0x5f7   :  { %v1696_v61 = vpop.f32.mrf.mxu1 }
 0x603   :  { %v1842_v62 = vpop.eup %1841 }
 0x604   :  { %v350_v63 = vadd.f32 1.0, %v1842_v62 }
 0x606   :  { %1843 = vrcp.f32 %v350_v63 }
 0x613   :  { %v1844_v0 = vpop.eup %1843 }
 0x614   :  { %v353_v1 = vmul.f32 2.0, %v1844_v0  ;;  %v355_v5 = vmul.f32 %v1844_v0, %v284_v49  ;;  %v154_v49 = vpop.f32.mrf.mxu0 }
 0x616   :  { %v1554_v2 = vadd.f32 -1.0, %v353_v1 }
 0x618   :  { %357 = vrot.lane.b32.xlu0 %v1554_v2, %s1925_s1 }
 0x68a   :  { %v358_v3 = vpop.permute.xlu0 %357 }
 0x68b   :  { %v360_v4 = vmul.f32 %v1844_v0, %v358_v3 }
 0x68d   :  { %362 = vrot.lane.b32.xlu1 %v360_v4, %s1925_s1 }
 0x6ff   :  { %v363_v6 = vpop.permute.xlu1 %362 }
 0x700   :  { %v365_v7 = vadd.f32 %v363_v6, %v355_v5 }
 0x702   :  { %1845 = vtanh.f32 %v365_v7 }
 0x70f   :  { %v1846_v8 = vpop.eup %1845 }
 0x710   :  { %368 = vrot.lane.b32.xlu0 %v1846_v8, %s1925_s1 }
 0x782   :  { %v369_v9 = vpop.permute.xlu0 %368 }
 0x783   :  { %v2073_v10 = vmul.f32 %v1844_v0, %v369_v9  ;;  %v155_v9 = vadd.f32 %v2010_v11, %v154_v49 }
 0x785   :  { %v380_v12 = vpack.c.bf16 %v2073_v10, %v2073_v10 }
 0x787   :  { %382 = vrot.lane.b32.xlu1 %v380_v12, %s1928_s30 }
 0x7f9   :  { %v383_v13 = vpop.permute.xlu1 %382 }
 0x7fa   :  { %1702 = vmatmul.mubr.msk.bf16.vlgmr.msra.gmra.mxu1 %vm198_vm2, %v383_v13 }
 0x7fb   :  { %1714 = vmatpush3.bf16.msra.mxu1 %v2018_v23  ;;  %1717 = vmatprep.mubr.msk.bf16.mxu1 %vm1927_vm1, %v1926_v22 }
 0x7fc   :  { %1715 = vmatprep.subr.bf16.mxu1 %v1926_v22 }
 0x7ff   :  { %1716 = vmatpush3.bf16.msra.mxu1 %v2027_v24 }
 0x800   :  { %1729 = vmatprep.subr.bf16.mxu1 %v1926_v22 }
 0x8ba   :  { %v421_v15 = vpop.f32.mrf.mxu1 }
 0x8bb   :  { %v427_v16 = vadd.f32 %v421_v15, %v147_v14 }
 0x8bc   :  { %v1703_v17 = vpop.f32.mrf.mxu1 }
 0x8bd   :  { %v1556_v18 = vmul.f32 -1.442695, %v427_v16 }
 0x8be   :  { %v424_v19 = vpop.f32.mrf.mxu1 }
 0x8bf   :  { %1847 = vpow2.f32 %v1556_v18 }
 0x8c0   :  { %v1704_v20 = vpop.f32.mrf.mxu1 }
 0x8cc   :  { %v1848_v21 = vpop.eup %1847 }
 0x8cd   :  { %v431_v25 = vadd.f32 1.0, %v1848_v21 }
 0x8cf   :  { %1849 = vrcp.f32 %v431_v25 }
 0x8dc   :  { %v1850_v26 = vpop.eup %1849 }
 0x8dd   :  { %v434_v28 = vmul.f32 2.0, %v1850_v26  ;;  %v436_v30 = vmul.f32 %v1850_v26, %v365_v7 }
 0x8df   :  { %v1557_v29 = vadd.f32 -1.0, %v434_v28 }
 0x8e1   :  { %438 = vrot.lane.b32.xlu0 %v1557_v29, %s1925_s1 }
 0x953   :  { %v439_v31 = vpop.permute.xlu0 %438 }
 0x954   :  { %v441_v32 = vmul.f32 %v1850_v26, %v439_v31 }
 0x956   :  { %443 = vrot.lane.b32.xlu1 %v441_v32, %s1925_s1 }
 0x9c8   :  { %v444_v33 = vpop.permute.xlu1 %443 }
 0x9c9   :  { %v446_v34 = vadd.f32 %v444_v33, %v436_v30  ;;  %v1823_v30 = vld [vmem:[%s2343_s4 + $0x8] sm:$0xff]  }
 0x9cb   :  { %1851 = vtanh.f32 %v446_v34 }
 0x9d8   :  { %v1852_v41 = vpop.eup %1851 }
 0x9d9   :  { %449 = vrot.lane.b32.xlu0 %v1852_v41, %s1925_s1 }
 0xa4b   :  { %v450_v42 = vpop.permute.xlu0 %449 }
 0xa4c   :  { %v2106_v43 = vmul.f32 %v1850_v26, %v450_v42 }
 0xa4e   :  { %v461_v44 = vpack.c.bf16 %v2106_v43, %v2106_v43 }
 0xa50   :  { %463 = vrot.lane.b32.xlu1 %v461_v44, %s1928_s30  ;;  %v160_v44 = vadd.f32 %v2117_v46, %v2010_v11 }
 0xac2   :  { %v464_v45 = vpop.permute.xlu1 %463 }
 0xac3   :  { %1710 = vmatmul.mubr.msk.bf16.vlgmr.msra.gmra.mxu0 %vm198_vm2, %v464_v45 }
 0xac4   :  { %1722 = vmatpush3.bf16.msra.mxu0 %v2018_v23  ;;  %1725 = vmatprep.mubr.msk.bf16.mxu0 %vm1927_vm1, %v1926_v22 }
 0xac5   :  { %1723 = vmatprep.subr.bf16.mxu0 %v1926_v22 }
 0xac8   :  { %1724 = vmatpush3.bf16.msra.mxu0 %v2027_v24 }
 0xac9   :  { %1737 = vmatprep.subr.bf16.mxu0 %v1823_v30 }
 0xb83   :  { %v502_v51 = vpop.f32.mrf.mxu0 }
 0xb84   :  { %v508_v53 = vadd.f32 %v502_v51, %v152_v50 }
 0xb85   :  { %v1711_v54 = vpop.f32.mrf.mxu0 }
 0xb86   :  { %v1559_v55 = vmul.f32 -1.442695, %v508_v53 }
 0xb87   :  { %v505_v56 = vpop.f32.mrf.mxu0 }
 0xb88   :  { %1853 = vpow2.f32 %v1559_v55 }
 0xb89   :  { %v1712_v57 = vpop.f32.mrf.mxu0 }
 0xb8a   :  { %v2178_v57 = vld [vmem:[%s2344_s6] ss:$0 sm:$0xff] }
 0xb95   :  { %v1854_v58 = vpop.eup %1853 }
 0xb96   :  { %v512_v59 = vadd.f32 1.0, %v1854_v58 }
 0xb98   :  { %1855 = vrcp.f32 %v512_v59 }
 0xba5   :  { %v1856_v60 = vpop.eup %1855 }
 0xba6   :  { %v515_v61 = vmul.f32 2.0, %v1856_v60  ;;  %v517_v1 = vmul.f32 %v1856_v60, %v446_v34 }
 0xba8   :  { %v1560_v62 = vadd.f32 -1.0, %v515_v61 }
 0xbaa   :  { %519 = vrot.lane.b32.xlu0 %v1560_v62, %s1925_s1 }
 0xc1c   :  { %v520_v63 = vpop.permute.xlu0 %519 }
 0xc1d   :  { %v522_v0 = vmul.f32 %v1856_v60, %v520_v63 }
 0xc1f   :  { %524 = vrot.lane.b32.xlu1 %v522_v0, %s1925_s1 }
 0xc91   :  { %v525_v2 = vpop.permute.xlu1 %524 }
 0xc92   :  { %v527_v3 = vadd.f32 %v525_v2, %v517_v1 }
 0xc94   :  { %1857 = vtanh.f32 %v527_v3 }
 0xca1   :  { %v1858_v4 = vpop.eup %1857 }
 0xca2   :  { %530 = vrot.lane.b32.xlu0 %v1858_v4, %s1925_s1 }
 0xd14   :  { %v531_v5 = vpop.permute.xlu0 %530 }
 0xd15   :  { %v2125_v6 = vmul.f32 %v1856_v60, %v531_v5 }
 0xd17   :  { %v542_v7 = vpack.c.bf16 %v2125_v6, %v2125_v6 }
 0xd19   :  { %544 = vrot.lane.b32.xlu1 %v542_v7, %s1928_s30 }
 0xd8b   :  { %v545_v8 = vpop.permute.xlu1 %544 }
 0xd8c   :  { %1718 = vmatmul.mubr.msk.bf16.vlgmr.msra.gmra.mxu1 %vm198_vm2, %v545_v8 }
 0xd8d   :  { %1730 = vmatpush3.bf16.msra.mxu1 %v2018_v23  ;;  %1733 = vmatprep.mubr.msk.bf16.mxu1 %vm1927_vm1, %v1926_v22 }
 0xd8e   :  { %1731 = vmatprep.subr.bf16.mxu1 %v1926_v22 }
 0xd91   :  { %1732 = vmatpush3.bf16.msra.mxu1 %v2027_v24 }
 0xd92   :  { %1749 = vmatprep.subr.bf16.mxu1 %v1926_v22 }
 0xe4c   :  { %v583_v12 = vpop.f32.mrf.mxu1 }
 0xe4d   :  { %v589_v13 = vadd.f32 %v583_v12, %v155_v9 }
 0xe4e   :  { %v1719_v14 = vpop.f32.mrf.mxu1 }
 0xe4f   :  { %v1562_v15 = vmul.f32 -1.442695, %v589_v13 }
 0xe50   :  { %v586_v16 = vpop.f32.mrf.mxu1 }
 0xe51   :  { %1859 = vpow2.f32 %v1562_v15 }
 0xe52   :  { %v1720_v17 = vpop.f32.mrf.mxu1 }
 0xe5e   :  { %v1860_v18 = vpop.eup %1859 }
 0xe5f   :  { %v593_v23 = vadd.f32 1.0, %v1860_v18 }
 0xe61   :  { %1861 = vrcp.f32 %v593_v23  ;;  %v2195_v23 = vld [vmem:[%s2345_s5 + $0x8] sm:$0xff]  }
 0xe6e   :  { %v1862_v19 = vpop.eup %1861 }
 0xe6f   :  { %v596_v20 = vmul.f32 2.0, %v1862_v19  ;;  %v598_v26 = vmul.f32 %v1862_v19, %v527_v3 }
 0xe71   :  { %v1563_v21 = vadd.f32 -1.0, %v596_v20 }
 0xe73   :  { %600 = vrot.lane.b32.xlu0 %v1563_v21, %s1925_s1 }
 0xee5   :  { %v601_v24 = vpop.permute.xlu0 %600 }
 0xee6   :  { %v603_v25 = vmul.f32 %v1862_v19, %v601_v24 }
 0xee8   :  { %605 = vrot.lane.b32.xlu1 %v603_v25, %s1925_s1 }
 0xf5a   :  { %v606_v28 = vpop.permute.xlu1 %605 }
 0xf5b   :  { %v2140_v29 = vadd.f32 %v606_v28, %v598_v26  ;;  %v163_v28 = vadd.f32 %v2119_v48, %v2010_v11 }
 0xf5d   :  { %1863 = vtanh.f32 %v2140_v29 }
 0xf6a   :  { %v1864_v31 = vpop.eup %1863 }
 0xf6b   :  { %611 = vrot.lane.b32.xlu0 %v1864_v31, %s1925_s1 }
 0xf6f   :  { %195 = vrot.lane.b32.xlu0 %v2038_v27, %s1928_s30 }
 0xf73   :  { %373 = vrot.lane.b32.xlu0 %v2073_v10, %s1928_s30  ;;  %v1824_v10 = vld [vmem:[%s2343_s4] sm:$0xff]  }
 0xfdd   :  { %v612_v32 = vpop.permute.xlu0 %611 }
 0xfde   :  { %v2151_v33 = vmul.f32 %v1862_v19, %v612_v32  ;;  %v2202_v19 = vld [vmem:[%s2345_s5] sm:$0xff]  }
 0xfe0   :  { %v623_v34 = vpack.c.bf16 %v2151_v33, %v2151_v33 }
 0xfe1   :  { %v196_v35 = vpop.permute.xlu0 %195 }
 0xfe2   :  { %199 = vst.msk [vmem:[#allocation3] sm:$0xff] %vm198_vm2, %v196_v35  ;;  %625 = vrot.lane.b32.xlu1 %v623_v34, %s1928_s30 }
 0xfe5   :  { %v374_v27 = vpop.permute.xlu0 %373 }
 0xfe6   :  { %377 = vst.msk [vmem:[#allocation3 + $0x10] sm:$0xff] %vm198_vm2, %v374_v27  ;;  %292 = vrot.lane.b32.xlu1 %v2056_v52, %s1928_s30 }
 0xfe9   :  { %v792_v52 = vld [vmem:[#allocation3] sm:$0xff] }
 0xfea   :  { %454 = vrot.lane.b32.xlu1 %v2106_v43, %s1928_s30 }
 0xfed   :  { %v794_v41 = vld [vmem:[#allocation3 + $0x10] sm:$0xff] }
0x1054   :  { %v626_v36 = vpop.permute.xlu1 %625 }
0x1055   :  { %1726 = vmatmul.mubr.msk.bf16.vlgmr.msra.gmra.mxu0 %vm198_vm2, %v626_v36 }
0x1056   :  { %1738 = vmatpush3.bf16.msra.mxu0 %v1823_v30 }
0x1057   :  { %1739 = vmatprep.subr.bf16.mxu0 %v1824_v10 }
0x1058   :  { %v293_v37 = vpop.permute.xlu1 %292 }
0x1059   :  { %296 = vst.msk [vmem:[#allocation3 + $0x8] sm:$0xff] %vm198_vm2, %v293_v37 }
0x105a   :  { %1740 = vmatpush3.bf16.msra.mxu0 %v1824_v10 }
0x105b   :  { %1765 = vmatprep.subr.bf16.mxu0 %v1926_v22 }
0x105c   :  { %v455_v38 = vpop.permute.xlu1 %454 }
0x105d   :  { %458 = vst.msk [vmem:[#allocation3 + $0x18] sm:$0xff] %vm198_vm2, %v455_v38 }
0x1060   :  { %v793_v39 = vld [vmem:[#allocation3 + $0x8] sm:$0xff] }
0x1061   :  { %v800_v40 = vpack.c.bf16 %v793_v39, %v792_v52 }
0x1063   :  { %1741 = vmatprep.mubr.msk.bf16.mxu0 %vm198_vm2, %v800_v40 }
0x1064   :  { %v795_v42 = vld [vmem:[#allocation3 + $0x18] sm:$0xff] }
0x1065   :  { %v801_v43 = vpack.c.bf16 %v795_v42, %v794_v41 }
0x1067   :  { %1742 = vmatmul.mubr.msk.bf16.vlgmr.msra.gmra.mxu0 %vm198_vm2, %v801_v43 }
0x1068   :  { %1766 = vmatpush3.bf16.msra.mxu0 %v2195_v23 }
0x1069   :  { %1767 = vmatprep.subr.bf16.mxu0 %v1926_v22 }
0x106c   :  { %1768 = vmatpush3.bf16.msra.mxu0 %v2202_v19 }
0x106d   :  { %1781 = vmatprep.subr.bf16.mxu0 %v1926_v22 }
0x1115   :  { %v664_v45 = vpop.f32.mrf.mxu0 }
0x1116   :  { %v670_v47 = vadd.f32 %v664_v45, %v160_v44 }
0x1117   :  { %v1727_v49 = vpop.f32.mrf.mxu0 }
0x1118   :  { %v1565_v50 = vmul.f32 -1.442695, %v670_v47 }
0x1119   :  { %v667_v51 = vpop.f32.mrf.mxu0 }
0x111a   :  { %1865 = vpow2.f32 %v1565_v50 }
0x111b   :  { %v1728_v53 = vpop.f32.mrf.mxu0 }
0x1127   :  { %v1866_v54 = vpop.eup %1865  ;;  %v2173_v55 = vpop.f32.mrf.mxu0 }
0x1128   :  { %v674_v56 = vadd.f32 1.0, %v1866_v54 }
0x1129   :  { %v868_v58 = vpop.f32.mrf.mxu0 }
0x112a   :  { %1867 = vrcp.f32 %v674_v56  ;;  %v869_v46 = vadd.f32 %v2178_v57, %v868_v58 }
0x112c   :  { %v1577_v59 = vmul.f32 -1.442695, %v869_v46 }
0x112e   :  { %1869 = vpow2.f32 %v1577_v59 }
0x1137   :  { %v1868_v60 = vpop.eup %1867 }
0x1138   :  { %v677_v61 = vmul.f32 2.0, %v1868_v60  ;;  %v679_v12 = vmul.f32 %v1868_v60, %v2140_v29  ;;  %v2227_v29 = vpop.f32.mrf.mxu0 }
0x113a   :  { %v1566_v62 = vadd.f32 -1.0, %v677_v61  ;;  %v871_v34 = vpop.f32.mrf.mxu0 }
0x113b   :  { %v1870_v63 = vpop.eup %1869  ;;  %v872_v10 = vadd.f32 %v2178_v57, %v871_v34 }
0x113c   :  { %v911_v0 = vadd.f32 1.0, %v1870_v63  ;;  %681 = vrot.lane.b32.xlu0 %v1566_v62, %s1925_s1 }
0x113e   :  { %1871 = vrcp.f32 %v911_v0 }
0x114b   :  { %v1872_v1 = vpop.eup %1871 }
0x114c   :  { %v914_v2 = vmul.f32 2.0, %v1872_v1 }
0x114e   :  { %v1578_v3 = vadd.f32 -1.0, %v914_v2 }
0x1150   :  { %917 = vrot.lane.b32.xlu0 %v1578_v3, %s1925_s1 }
0x11ae   :  { %v682_v4 = vpop.permute.xlu0 %681 }
0x11af   :  { %v684_v5 = vmul.f32 %v1868_v60, %v682_v4 }
0x11b1   :  { %686 = vrot.lane.b32.xlu1 %v684_v5, %s1925_s1 }
0x11c2   :  { %v918_v7 = vpop.permute.xlu0 %917 }
0x11c3   :  { %v920_v8 = vmul.f32 %v1872_v1, %v918_v7 }
0x11c5   :  { %1873 = vtanh.f32 %v920_v8 }
0x11d2   :  { %v1874_v9 = vpop.eup %1873 }
0x11d3   :  { %923 = vrot.lane.b32.xlu0 %v1874_v9, %s1928_s30 }
0x1223   :  { %v687_v13 = vpop.permute.xlu1 %686 }
0x1224   :  { %v2186_v14 = vadd.f32 %v687_v13, %v679_v12  ;;  %v877_v13 = vadd.f32 %v2173_v55, %v2178_v57 }
0x1226   :  { %1875 = vtanh.f32 %v2186_v14 }
0x1233   :  { %v1876_v15 = vpop.eup %1875 }
0x1234   :  { %692 = vrot.lane.b32.xlu1 %v1876_v15, %s1925_s1 }
0x1245   :  { %v924_v16 = vpop.permute.xlu0 %923 }
0x1246   :  { %v926_v17 = vmul.f32 %v1872_v1, %v924_v16 }
0x1248   :  { %v928_v18 = vpack.c.bf16 %v926_v17, %v926_v17 }
0x124a   :  { %930 = vrot.lane.b32.xlu0 %v928_v18, %s1928_s30 }
0x124e   :  { %997 = vrot.lane.b32.xlu0 %v920_v8, %s1925_s1 }
0x12a6   :  { %v693_v20 = vpop.permute.xlu1 %692 }
0x12a7   :  { %v2206_v21 = vmul.f32 %v1868_v60, %v693_v20 }
0x12a9   :  { %v704_v24 = vpack.c.bf16 %v2206_v21, %v2206_v21 }
0x12ab   :  { %706 = vrot.lane.b32.xlu1 %v704_v24, %s1928_s30 }
0x12bc   :  { %v931_v26 = vpop.permute.xlu0 %930 }
0x12c0   :  { %v998_v51 = vpop.permute.xlu0 %997 }
0x131d   :  { %v707_v25 = vpop.permute.xlu1 %706 }
0x131e   :  { %1734 = vmatmul.mubr.msk.bf16.vlgmr.msra.gmra.mxu1 %vm198_vm2, %v707_v25 }
0x131f   :  { %1750 = vmatpush3.bf16.msra.mxu1 %v2195_v23  ;;  %1753 = vmatprep.mubr.msk.bf16.mxu1 %vm1927_vm1, %v1926_v22 }
0x1320   :  { %1751 = vmatprep.subr.bf16.mxu1 %v1926_v22 }
0x1323   :  { %1752 = vmatpush3.bf16.msra.mxu1 %v2202_v19 }
0x1324   :  { %1757 = vmatprep.subr.bf16.mxu1 %v1926_v22 }
0x1326   :  { %1754 = vmatmul.mubr.msk.bf16.vlgmr.msra.gmra.mxu1 %vm198_vm2, %v931_v26 }
0x1327   :  { %1758 = vmatpush3.bf16.msra.mxu1 %v2195_v23  ;;  %1761 = vmatprep.mubr.msk.bf16.mxu1 %vm1927_vm1, %v1926_v22 }
0x1328   :  { %1759 = vmatprep.subr.bf16.mxu1 %v1926_v22 }
0x132b   :  { %1760 = vmatpush3.bf16.msra.mxu1 %v2202_v19 }
0x132c   :  { %1773 = vmatprep.subr.bf16.mxu1 %v1926_v22 }
0x13de   :  { %v745_v31 = vpop.f32.mrf.mxu1 }
0x13df   :  { %v751_v32 = vadd.f32 %v745_v31, %v163_v28 }
0x13e0   :  { %v1735_v30 = vpop.f32.mrf.mxu1 }
0x13e1   :  { %v1568_v47 = vmul.f32 -1.442695, %v751_v32 }
0x13e2   :  { %v748_v35 = vpop.f32.mrf.mxu1 }
0x13e4   :  { %v1736_v27 = vpop.f32.mrf.mxu1 }
0x13e6   :  { %v981_v36 = vpop.f32.mrf.mxu1 }
0x13e7   :  { %v987_v37 = vadd.f32 %v981_v36, %v872_v10 }
0x13e8   :  { %v1755_v38 = vpop.f32.mrf.mxu1 }
0x13e9   :  { %v1582_v52 = vmul.f32 -1.442695, %v987_v37 }
0x13ea   :  { %v984_v39 = vpop.f32.mrf.mxu1 }
0x13eb   :  { %1877 = vpow2.f32 %v1582_v52 }
0x13ec   :  { %v1756_v40 = vpop.f32.mrf.mxu1 }
0x13f8   :  { %v1878_v41 = vpop.eup %1877 }
0x13f9   :  { %v991_v42 = vadd.f32 1.0, %v1878_v41 }
0x13fb   :  { %1879 = vrcp.f32 %v991_v42 }
0x13fc   :  { %1881 = vpow2.f32 %v1568_v47  ;;  %v880_v47 = vadd.f32 %v2227_v29, %v2178_v57 }
0x1408   :  { %v1880_v11 = vpop.eup %1879 }
0x1409   :  { %v994_v48 = vmul.f32 2.0, %v1880_v11  ;;  %v1882_v49 = vpop.eup %1881  ;;  %v1000_v53 = vmul.f32 %v1880_v11, %v998_v51 }
0x140a   :  { %v755_v50 = vadd.f32 1.0, %v1882_v49 }
0x140b   :  { %v1583_v43 = vadd.f32 -1.0, %v994_v48 }
0x140c   :  { %1883 = vrcp.f32 %v755_v50 }
0x140d   :  { %1002 = vrot.lane.b32.xlu1 %v1583_v43, %s1925_s1 }
0x1419   :  { %v1884_v58 = vpop.eup %1883 }
0x141a   :  { %v758_v46 = vmul.f32 2.0, %v1884_v58  ;;  %v760_v3 = vmul.f32 %v1884_v58, %v2186_v14 }
0x141c   :  { %v1569_v60 = vadd.f32 -1.0, %v758_v46 }
0x147f   :  { %v1003_v44 = vpop.permute.xlu1 %1002 }
0x1480   :  { %v1005_v45 = vmul.f32 %v1880_v11, %v1003_v44 }
0x1482   :  { %1007 = vrot.lane.b32.xlu1 %v1005_v45, %s1925_s1 }
0x14f4   :  { %v1008_v54 = vpop.permute.xlu1 %1007 }
0x14f5   :  { %v1010_v56 = vadd.f32 %v1008_v54, %v1000_v53 }
0x14f7   :  { %1885 = vtanh.f32 %v1010_v56 }
0x1504   :  { %v1886_v59 = vpop.eup %1885 }
0x1505   :  { %1013 = vrot.lane.b32.xlu0 %v1886_v59, %s1925_s1 }
0x1509   :  { %762 = vrot.lane.b32.xlu0 %v1569_v60, %s1925_s1 }
0x1577   :  { %v1014_v61 = vpop.permute.xlu0 %1013 }
0x1578   :  { %v1016_v62 = vmul.f32 %v1880_v11, %v1014_v61 }
0x157a   :  { %v1018_v63 = vpack.c.bf16 %v1016_v62, %v1016_v62 }
0x157b   :  { %v763_v0 = vpop.permute.xlu0 %762 }
0x157c   :  { %v765_v1 = vmul.f32 %v1884_v58, %v763_v0  ;;  %1020 = vrot.lane.b32.xlu1 %v1018_v63, %s1928_s30 }
0x157e   :  { %767 = vrot.lane.b32.xlu0 %v765_v1, %s1925_s1 }
0x15ee   :  { %v1021_v2 = vpop.permute.xlu1 %1020 }
0x15ef   :  { %1762 = vmatmul.mubr.msk.bf16.vlgmr.msra.gmra.mxu1 %vm198_vm2, %v1021_v2 }
0x15f0   :  { %v768_v4 = vpop.permute.xlu0 %767  ;;  %1774 = vmatpush3.bf16.msra.mxu1 %v2195_v23  ;;  %1777 = vmatprep.mubr.msk.bf16.mxu1 %vm1927_vm1, %v1926_v22 }
0x15f1   :  { %v770_v5 = vadd.f32 %v768_v4, %v760_v3  ;;  %1775 = vmatprep.subr.bf16.mxu1 %v1926_v22 }
0x15f3   :  { %1887 = vtanh.f32 %v770_v5 }
0x15f4   :  { %1776 = vmatpush3.bf16.msra.mxu1 %v2202_v19 }
0x15f5   :  { %1789 = vmatprep.subr.bf16.mxu1 %v1926_v22 }
0x1600   :  { %v1888_v7 = vpop.eup %1887 }
0x1601   :  { %773 = vrot.lane.b32.xlu0 %v1888_v7, %s1925_s1 }
0x1605   :  { %535 = vrot.lane.b32.xlu0 %v2125_v6, %s1928_s30 }
0x1609   :  { %697 = vrot.lane.b32.xlu0 %v2206_v21, %s1928_s30 }
0x1673   :  { %v774_v8 = vpop.permute.xlu0 %773 }
0x1674   :  { %v776_v35 = vmul.f32 %v1884_v58, %v774_v8 }
0x1677   :  { %v536_v9 = vpop.permute.xlu0 %535 }
0x1678   :  { %539 = vst.msk [vmem:[#allocation3 + $0x20] sm:$0xff] %vm198_vm2, %v536_v9 }
0x167b   :  { %v698_v12 = vpop.permute.xlu0 %697 }
0x167c   :  { %701 = vst.msk [vmem:[#allocation3 + $0x30] sm:$0xff] %vm198_vm2, %v698_v12 }
0x167f   :  { %v796_v52 = vld [vmem:[#allocation3 + $0x20] sm:$0xff] }
0x16af   :  { %v1059_v14 = vpop.f32.mrf.mxu1 }
0x16b0   :  { %v1065_v15 = vadd.f32 %v1059_v14, %v877_v13 }
0x16b1   :  { %v1763_v16 = vpop.f32.mrf.mxu1 }
0x16b2   :  { %v1585_v17 = vmul.f32 -1.442695, %v1065_v15 }
0x16b3   :  { %v1062_v18 = vpop.f32.mrf.mxu1 }
0x16b4   :  { %1889 = vpow2.f32 %v1585_v17 }
0x16b5   :  { %v1764_v6 = vpop.f32.mrf.mxu1 }
0x16c1   :  { %v1890_v20 = vpop.eup %1889 }
0x16c2   :  { %v1069_v24 = vadd.f32 1.0, %v1890_v20 }
0x16c4   :  { %1891 = vrcp.f32 %v1069_v24 }
0x16d1   :  { %v1892_v21 = vpop.eup %1891 }
0x16d2   :  { %v1072_v25 = vmul.f32 2.0, %v1892_v21  ;;  %v1074_v55 = vmul.f32 %v1892_v21, %v1010_v56 }
0x16d4   :  { %v1586_v26 = vadd.f32 -1.0, %v1072_v25 }
0x16d6   :  { %1076 = vrot.lane.b32.xlu1 %v1586_v26, %s1925_s1 }
0x1748   :  { %v1077_v28 = vpop.permute.xlu1 %1076 }
0x1749   :  { %v1079_v31 = vmul.f32 %v1892_v21, %v1077_v28 }
0x174b   :  { %1081 = vrot.lane.b32.xlu1 %v1079_v31, %s1925_s1 }
0x17bd   :  { %v1082_v32 = vpop.permute.xlu1 %1081 }
0x17be   :  { %v1084_v30 = vadd.f32 %v1082_v32, %v1074_v55 }
0x17c0   :  { %1893 = vtanh.f32 %v1084_v30 }
0x17cd   :  { %v1894_v34 = vpop.eup %1893 }
0x17ce   :  { %1087 = vrot.lane.b32.xlu1 %v1894_v34, %s1925_s1 }
0x17d2   :  { %616 = vrot.lane.b32.xlu1 %v2151_v33, %s1928_s30  ;;  %v798_v33 = vld [vmem:[#allocation3 + $0x30] sm:$0xff] }
0x17d6   :  { %778 = vrot.lane.b32.xlu1 %v776_v35, %s1928_s30 }
0x1840   :  { %v1088_v27 = vpop.permute.xlu1 %1087 }
0x1841   :  { %v1090_v10 = vmul.f32 %v1892_v21, %v1088_v27 }
0x1843   :  { %v1092_v36 = vpack.c.bf16 %v1090_v10, %v1090_v10 }
0x1844   :  { %v617_v37 = vpop.permute.xlu1 %616 }
0x1845   :  { %620 = vst.msk [vmem:[#allocation3 + $0x28] sm:$0xff] %vm198_vm2, %v617_v37  ;;  %1094 = vrot.lane.b32.xlu0 %v1092_v36, %s1928_s30 }
0x1848   :  { %v779_v38 = vpop.permute.xlu1 %778 }
0x1849   :  { %782 = vst.msk [vmem:[#allocation3 + $0x38] sm:$0xff] %vm198_vm2, %v779_v38 }
0x184c   :  { %v797_v39 = vld [vmem:[#allocation3 + $0x28] sm:$0xff] }
0x184d   :  { %v802_v40 = vpack.c.bf16 %v797_v39, %v796_v52 }
0x184f   :  { %1745 = vmatprep.mubr.msk.bf16.mxu0 %vm198_vm2, %v802_v40 }
0x1850   :  { %v799_v41 = vld [vmem:[#allocation3 + $0x38] sm:$0xff] }
0x1851   :  { %v803_v42 = vpack.c.bf16 %v799_v41, %v798_v33 }
0x1853   :  { %1746 = vmatmul.mubr.msk.bf16.gmra.mxu0 %vm198_vm2, %v803_v42 }
0x1854   :  { %1769 = vmatprep.mubr.msk.bf16.mxu0 %vm1927_vm1, %v1926_v22 }
0x18b7   :  { %v1095_v11 = vpop.permute.xlu0 %1094 }
0x18b8   :  { %1770 = vmatmul.mubr.msk.bf16.vlgmr.msra.gmra.mxu0 %vm198_vm2, %v1095_v11 }
0x18b9   :  { %1782 = vmatpush3.bf16.msra.mxu0 %v2195_v23  ;;  %1785 = vmatprep.mubr.msk.bf16.mxu0 %vm1927_vm1, %v1926_v22 }
0x18ba   :  { %1783 = vmatprep.subr.bf16.mxu0 %v1926_v22 }
0x18bd   :  { %1784 = vmatpush3.bf16.msra.mxu0 %v2202_v19 }
0x18be   :  { %1797 = vmatprep.subr.bf16.mxu0 %v1926_v22 }
0x1913   :  { %v2273_v48 = vpop.f32.mrf.mxu0 }
0x1915   :  { %v884_v43 = vpop.f32.mrf.mxu0 }
0x1916   :  { %v885_v8 = vadd.f32 %v2178_v57, %v884_v43 }
0x1917   :  { %v2275_v44 = vpop.f32.mrf.mxu0 }
0x1919   :  { %v2277_v45 = vpop.f32.mrf.mxu0 }
0x191a   :  { %v888_v27 = vadd.f32 %v2178_v57, %v2277_v45 }
0x1978   :  { %v1133_v49 = vpop.f32.mrf.mxu0 }
0x1979   :  { %v1139_v50 = vadd.f32 %v1133_v49, %v880_v47 }
0x197a   :  { %v1771_v51 = vpop.f32.mrf.mxu0 }
0x197b   :  { %v1588_v53 = vmul.f32 -1.442695, %v1139_v50 }
0x197c   :  { %v1136_v54 = vpop.f32.mrf.mxu0 }
0x197d   :  { %1895 = vpow2.f32 %v1588_v53 }
0x197e   :  { %v1772_v56 = vpop.f32.mrf.mxu0 }
0x197f   :  { %v893_v56 = vadd.f32 %v2273_v48, %v2178_v57 }
0x198a   :  { %v1896_v58 = vpop.eup %1895 }
0x198b   :  { %v1143_v46 = vadd.f32 1.0, %v1896_v58 }
0x198d   :  { %1897 = vrcp.f32 %v1143_v46 }
0x199a   :  { %v1898_v59 = vpop.eup %1897 }
0x199b   :  { %v1146_v60 = vmul.f32 2.0, %v1898_v59  ;;  %v1148_v29 = vmul.f32 %v1898_v59, %v1084_v30 }
0x199d   :  { %v1589_v61 = vadd.f32 -1.0, %v1146_v60 }
0x199f   :  { %1150 = vrot.lane.b32.xlu1 %v1589_v61, %s1925_s1 }
0x1a11   :  { %v1151_v62 = vpop.permute.xlu1 %1150 }
0x1a12   :  { %v1153_v63 = vmul.f32 %v1898_v59, %v1151_v62 }
0x1a14   :  { %1155 = vrot.lane.b32.xlu0 %v1153_v63, %s1925_s1 }
0x1a86   :  { %v1156_v0 = vpop.permute.xlu0 %1155 }
0x1a87   :  { %v1158_v1 = vadd.f32 %v1156_v0, %v1148_v29 }
0x1a89   :  { %1899 = vtanh.f32 %v1158_v1 }
0x1a96   :  { %v1900_v2 = vpop.eup %1899 }
0x1a97   :  { %1161 = vrot.lane.b32.xlu1 %v1900_v2, %s1925_s1 }
0x1b09   :  { %v1162_v3 = vpop.permute.xlu1 %1161 }
0x1b0a   :  { %v1164_v4 = vmul.f32 %v1898_v59, %v1162_v3 }
0x1b0c   :  { %v1166_v5 = vpack.c.bf16 %v1164_v4, %v1164_v4 }
0x1b0e   :  { %1168 = vrot.lane.b32.xlu0 %v1166_v5, %s1928_s30 }
0x1b80   :  { %v1169_v7 = vpop.permute.xlu0 %1168 }
0x1b81   :  { %1778 = vmatmul.mubr.msk.bf16.vlgmr.msra.gmra.mxu1 %vm198_vm2, %v1169_v7 }
0x1b82   :  { %1790 = vmatpush3.bf16.msra.mxu1 %v2195_v23  ;;  %1793 = vmatprep.mubr.msk.bf16.mxu1 %vm1927_vm1, %v1926_v22 }
0x1b83   :  { %1791 = vmatprep.subr.bf16.mxu1 %v1926_v22 }
0x1b86   :  { %1792 = vmatpush3.bf16.msra.mxu1 %v2202_v19 }
0x1b87   :  { %1805 = vmatprep.subr.bf16.mxu1 %v1926_v22 }
0x1c41   :  { %v1207_v9 = vpop.f32.mrf.mxu1 }
0x1c42   :  { %v1213_v12 = vadd.f32 %v1207_v9, %v885_v8 }
0x1c43   :  { %v1779_v13 = vpop.f32.mrf.mxu1 }
0x1c44   :  { %v1591_v14 = vmul.f32 -1.442695, %v1213_v12 }
0x1c45   :  { %v1210_v15 = vpop.f32.mrf.mxu1 }
0x1c46   :  { %1901 = vpow2.f32 %v1591_v14  ;;  %v896_v15 = vadd.f32 %v2275_v44, %v2178_v57 }
0x1c47   :  { %v1780_v16 = vpop.f32.mrf.mxu1 }
0x1c53   :  { %v1902_v17 = vpop.eup %1901 }
0x1c54   :  { %v1217_v18 = vadd.f32 1.0, %v1902_v17 }
0x1c56   :  { %1903 = vrcp.f32 %v1217_v18 }
0x1c63   :  { %v1904_v6 = vpop.eup %1903 }
0x1c64   :  { %v1220_v20 = vmul.f32 2.0, %v1904_v6  ;;  %v1222_v26 = vmul.f32 %v1904_v6, %v1158_v1 }
0x1c66   :  { %v1592_v24 = vadd.f32 -1.0, %v1220_v20 }
0x1c68   :  { %1224 = vrot.lane.b32.xlu1 %v1592_v24, %s1925_s1 }
0x1cda   :  { %v1225_v21 = vpop.permute.xlu1 %1224 }
0x1cdb   :  { %v1227_v25 = vmul.f32 %v1904_v6, %v1225_v21 }
0x1cdd   :  { %1229 = vrot.lane.b32.xlu0 %v1227_v25, %s1925_s1 }
0x1d4f   :  { %v1230_v28 = vpop.permute.xlu0 %1229 }
0x1d50   :  { %v1232_v31 = vadd.f32 %v1230_v28, %v1222_v26 }
0x1d52   :  { %1905 = vtanh.f32 %v1232_v31 }
0x1d5f   :  { %v1906_v55 = vpop.eup %1905 }
0x1d60   :  { %1235 = vrot.lane.b32.xlu1 %v1906_v55, %s1925_s1 }
0x1dd2   :  { %v1236_v32 = vpop.permute.xlu1 %1235 }
0x1dd3   :  { %v1238_v30 = vmul.f32 %v1904_v6, %v1236_v32 }
0x1dd5   :  { %v1240_v34 = vpack.c.bf16 %v1238_v30, %v1238_v30 }
0x1dd7   :  { %1242 = vrot.lane.b32.xlu0 %v1240_v34, %s1928_s30  ;;  %v1827_v34 = vld [vmem:[%s2346_s7 + $0x8] sm:$0xff]  }
0x1e49   :  { %v1243_v35 = vpop.permute.xlu0 %1242 }
0x1e4a   :  { %1786 = vmatmul.mubr.msk.bf16.vlgmr.msra.gmra.mxu0 %vm198_vm2, %v1243_v35  ;;  %v1828_v35 = vld [vmem:[%s2346_s7] sm:$0xff]  }
0x1e4b   :  { %1798 = vmatpush3.bf16.msra.mxu0 %v2195_v23  ;;  %1801 = vmatprep.mubr.msk.bf16.mxu0 %vm1927_vm1, %v1926_v22 }
0x1e4c   :  { %1799 = vmatprep.subr.bf16.mxu0 %v1926_v22 }
0x1e4f   :  { %1800 = vmatpush3.bf16.msra.mxu0 %v2202_v19 }
0x1f0a   :  { %v1281_v10 = vpop.f32.mrf.mxu0 }
0x1f0b   :  { %v1287_v36 = vadd.f32 %v1281_v10, %v888_v27 }
0x1f0c   :  { %v1787_v37 = vpop.f32.mrf.mxu0 }
0x1f0d   :  { %v1594_v38 = vmul.f32 -1.442695, %v1287_v36 }
0x1f0e   :  { %v1284_v52 = vpop.f32.mrf.mxu0 }
0x1f0f   :  { %1907 = vpow2.f32 %v1594_v38  ;;  %v1602_v52 = vld [vmem:[%s2347_s8] ss:$0 sm:$0xff] }
0x1f10   :  { %v1788_v39 = vpop.f32.mrf.mxu0 }
0x1f1c   :  { %v1908_v40 = vpop.eup %1907 }
0x1f1d   :  { %v1291_v33 = vadd.f32 1.0, %v1908_v40 }
0x1f1f   :  { %1909 = vrcp.f32 %v1291_v33 }
0x1f2c   :  { %v1910_v23 = vpop.eup %1909 }
0x1f2d   :  { %v1294_v41 = vmul.f32 2.0, %v1910_v23  ;;  %v1296_v43 = vmul.f32 %v1910_v23, %v1232_v31 }
0x1f2f   :  { %v1595_v42 = vadd.f32 -1.0, %v1294_v41 }
0x1f31   :  { %1298 = vrot.lane.b32.xlu1 %v1595_v42, %s1925_s1 }
0x1fa3   :  { %v1299_v11 = vpop.permute.xlu1 %1298 }
0x1fa4   :  { %v1301_v19 = vmul.f32 %v1910_v23, %v1299_v11 }
0x1fa6   :  { %1303 = vrot.lane.b32.xlu0 %v1301_v19, %s1925_s1 }
0x2018   :  { %v1304_v45 = vpop.permute.xlu0 %1303 }
0x2019   :  { %v1306_v47 = vadd.f32 %v1304_v45, %v1296_v43 }
0x201b   :  { %1911 = vtanh.f32 %v1306_v47 }
0x2028   :  { %v1912_v49 = vpop.eup %1911 }
0x2029   :  { %1309 = vrot.lane.b32.xlu1 %v1912_v49, %s1925_s1 }
0x209b   :  { %v1310_v50 = vpop.permute.xlu1 %1309 }
0x209c   :  { %v1312_v51 = vmul.f32 %v1910_v23, %v1310_v50 }
0x209e   :  { %v1314_v53 = vpack.c.bf16 %v1312_v51, %v1312_v51 }
0x20a0   :  { %1316 = vrot.lane.b32.xlu0 %v1314_v53, %s1928_s30 }
0x2112   :  { %v1317_v54 = vpop.permute.xlu0 %1316 }
0x2113   :  { %1794 = vmatmul.mubr.msk.bf16.vlgmr.msra.gmra.mxu1 %vm198_vm2, %v1317_v54 }
0x2114   :  { %1809 = vmatprep.mubr.msk.bf16.mxu1 %vm1927_vm1, %v1926_v22  ;;  %1806 = vmatpush3.bf16.msra.mxu1 %v1827_v34 }
0x2115   :  { %1807 = vmatprep.subr.bf16.mxu1 %v1926_v22 }
0x2118   :  { %1808 = vmatpush3.bf16.msra.mxu1 %v1828_v35 }
0x21d3   :  { %v1355_v58 = vpop.f32.mrf.mxu1 }
0x21d4   :  { %v1361_v46 = vadd.f32 %v1355_v58, %v893_v56 }
0x21d5   :  { %v1795_v59 = vpop.f32.mrf.mxu1 }
0x21d6   :  { %v1597_v60 = vmul.f32 -1.442695, %v1361_v46 }
0x21d7   :  { %v1358_v61 = vpop.f32.mrf.mxu1 }
0x21d8   :  { %1913 = vpow2.f32 %v1597_v60 }
0x21d9   :  { %v1796_v62 = vpop.f32.mrf.mxu1 }
0x21e5   :  { %v1914_v63 = vpop.eup %1913 }
0x21e6   :  { %v1365_v29 = vadd.f32 1.0, %v1914_v63 }
0x21e8   :  { %1915 = vrcp.f32 %v1365_v29 }
0x21f5   :  { %v1916_v0 = vpop.eup %1915 }
0x21f6   :  { %v1368_v1 = vmul.f32 2.0, %v1916_v0  ;;  %v1370_v48 = vmul.f32 %v1916_v0, %v1306_v47 }
0x21f8   :  { %v1598_v2 = vadd.f32 -1.0, %v1368_v1 }
0x21fa   :  { %1372 = vrot.lane.b32.xlu1 %v1598_v2, %s1925_s1 }
0x226c   :  { %v1373_v3 = vpop.permute.xlu1 %1372 }
0x226d   :  { %v1375_v4 = vmul.f32 %v1916_v0, %v1373_v3 }
0x226f   :  { %1377 = vrot.lane.b32.xlu0 %v1375_v4, %s1925_s1 }
0x22e1   :  { %v1378_v5 = vpop.permute.xlu0 %1377 }
0x22e2   :  { %v1380_v7 = vadd.f32 %v1378_v5, %v1370_v48 }
0x22e4   :  { %1917 = vtanh.f32 %v1380_v7 }
0x22f1   :  { %v1918_v8 = vpop.eup %1917 }
0x22f2   :  { %1383 = vrot.lane.b32.xlu1 %v1918_v8, %s1925_s1 }
0x2364   :  { %v1384_v9 = vpop.permute.xlu1 %1383 }
0x2365   :  { %v1386_v12 = vmul.f32 %v1916_v0, %v1384_v9 }
0x2367   :  { %v1388_v13 = vpack.c.bf16 %v1386_v12, %v1386_v12 }
0x2369   :  { %1390 = vrot.lane.b32.xlu0 %v1388_v13, %s1928_s30 }
0x23db   :  { %v1391_v14 = vpop.permute.xlu0 %1390 }
0x23dc   :  { %1802 = vmatmul.mubr.msk.bf16.vlgmr.msra.gmra.mxu0 %vm198_vm2, %v1391_v14 }
0x249c   :  { %v1429_v16 = vpop.f32.mrf.mxu0 }
0x249d   :  { %v1435_v17 = vadd.f32 %v1429_v16, %v896_v15 }
0x249e   :  { %v1803_v18 = vpop.f32.mrf.mxu0 }
0x249f   :  { %v1600_v6 = vmul.f32 -1.442695, %v1435_v17 }
0x24a0   :  { %v1432_v20 = vpop.f32.mrf.mxu0 }
0x24a1   :  { %1919 = vpow2.f32 %v1600_v6 }
0x24a2   :  { %v1804_v24 = vpop.f32.mrf.mxu0 }
0x24ae   :  { %v1920_v21 = vpop.eup %1919 }
0x24af   :  { %v1439_v25 = vadd.f32 1.0, %v1920_v21 }
0x24b1   :  { %1921 = vrcp.f32 %v1439_v25 }
0x24be   :  { %v1922_v26 = vpop.eup %1921 }
0x24bf   :  { %v1442_v28 = vmul.f32 2.0, %v1922_v26  ;;  %v1444_v57 = vmul.f32 %v1922_v26, %v1380_v7 }
0x24c1   :  { %v1601_v31 = vadd.f32 -1.0, %v1442_v28 }
0x24c3   :  { %1446 = vrot.lane.b32.xlu1 %v1601_v31, %s1925_s1 }
0x2535   :  { %v1447_v55 = vpop.permute.xlu1 %1446 }
0x2536   :  { %v1449_v32 = vmul.f32 %v1922_v26, %v1447_v55 }
0x2538   :  { %1451 = vrot.lane.b32.xlu0 %v1449_v32, %s1925_s1 }
0x25aa   :  { %v1452_v44 = vpop.permute.xlu0 %1451 }
0x25ab   :  { %v1454_v30 = vadd.f32 %v1452_v44, %v1444_v57 }
0x25ad   :  { %1923 = vtanh.f32 %v1454_v30 }
0x25ba   :  { %v1924_v27 = vpop.eup %1923 }
0x25bb   :  { %1457 = vrot.lane.b32.xlu1 %v1924_v27, %s1925_s1 }
0x262d   :  { %v1458_v10 = vpop.permute.xlu1 %1457 }
0x262e   :  { %v1460_v36 = vmul.f32 %v1922_v26, %v1458_v10 }
0x2630   :  { %v1466_v37 = vpack.c.bf16 %v1460_v36, %v1460_v36 }
0x2632   :  { %1474 = vrot.lane.b32.xlu0 %v1466_v37, %s1928_s30 }
0x26a4   :  { %v1475_v38 = vpop.permute.xlu0 %1474 }
0x26a5   :  { %1810 = vmatmul.mubr.msk.bf16.vlgmr.msra.gmra.mxu1 %vm198_vm2, %v1475_v38 }
0x2765   :  { %v1525_v39 = vpop.f32.mrf.mxu1 }
0x2766   :  { %v1526_v40 = vadd.f32 %v1602_v52, %v1525_v39 }
0x2767   :  { %v1811_v33 = vpop.f32.mrf.mxu1 }
0x2768   :  { %1531 = vst [vmem:[%s2348_s9] sm:$0xff] %v1526_v40 }
0x2769   :  { %v1528_v22 = vpop.f32.mrf.mxu1 }
0x276b   :  { %v1812_v23 = vpop.f32.mrf.mxu1 }

</bundles_post_ra>
